<compile_context>
chip_gen: v6e
topology: v6e:2x2x1
jax: 0.10.0
libtpu: 0.0.40
codegen_flags: <defaults>
</compile_context>

<pallas_src>
import functools
import math

import jax
import jax.numpy as jnp
from jax.experimental import pallas as pl
from jax.experimental.pallas import tpu as pltpu


def _resampler_kernel(num_heads, head_dim,
                      x_ref, q_ref,
                      wk_ref, bk_ref, wv_ref, bv_ref,
                      wo_ref, bo_ref,
                      out_ref):
    TB, S, E = x_ref.shape
    H, Dh = num_heads, head_dim
    L = wk_ref.shape[1]
    Q = q_ref.shape[1]

    # ---- Fused projections: (external Linear ∘ MHA in-proj) folded by the wrapper
    # into one (TB*S, E) @ (E, L) matmul per stream.
    xf = x_ref[...].reshape(TB * S, E)                                     # bf16
    k = jnp.dot(xf, wk_ref[...], preferred_element_type=jnp.float32) + bk_ref[...]
    v = jnp.dot(xf, wv_ref[...], preferred_element_type=jnp.float32) + bv_ref[...]

    k3 = k.astype(jnp.bfloat16).reshape(TB, S, L)
    v3 = v.astype(jnp.bfloat16).reshape(TB, S, L)

    # ---- Head split: one structured relayout (TB, S, L) -> (H*TB, S, Dh),
    # batch index = h*TB + b.  Static slices + concat, outside any compute chain.
    k_bh = jnp.concatenate([k3[:, :, h * Dh:(h + 1) * Dh] for h in range(H)], axis=0)
    v_bh = jnp.concatenate([v3[:, :, h * Dh:(h + 1) * Dh] for h in range(H)], axis=0)

    # ---- Attention: a single head-batched einsum pair (batch = H*TB).
    # q_ref is already in-projected, scaled by 1/sqrt(Dh) and tiled to (H*TB, Q, Dh).
    s = jnp.einsum("bqd,bkd->bqk", q_ref[...], k_bh,
                   preferred_element_type=jnp.float32)                     # (H*TB, Q, S)
    s = s - jnp.max(s, axis=-1, keepdims=True)
    p = jnp.exp(s)
    p = p * pl.reciprocal(jnp.sum(p, axis=-1, keepdims=True), approx=True)
    ctx = jnp.einsum("bqk,bkd->bqd", p.astype(jnp.bfloat16), v_bh,
                     preferred_element_type=jnp.float32)                   # (H*TB, Q, Dh)

    # ---- Concat heads (head-major lanes) and one full-width (K = L) out projection.
    ctx_cat = jnp.concatenate([ctx[h * TB:(h + 1) * TB] for h in range(H)], axis=-1)
    ctx2 = ctx_cat.reshape(TB * Q, L).astype(jnp.bfloat16)
    out = jnp.dot(ctx2, wo_ref[...], preferred_element_type=jnp.float32) + bo_ref[...]
    out_ref[...] = out.reshape(TB, Q, L).astype(out_ref.dtype)


def _vmem_capacity_bytes():
    try:
        return int(pltpu.get_tpu_info().vmem_capacity_bytes)
    except Exception:
        return 128 << 20  # conservative default (v5e/v6e class)


def _step_vmem_bytes(tb, S, E, Q, L, H, single_buffer):
    """Rough per-grid-step VMEM footprint estimate (bytes)."""
    dh = L // H
    wbuf = 1 if single_buffer else 2
    weights = wbuf * (H * tb * Q * dh * 2        # tiled queries (bf16)
                      + 2 * E * L * 2            # fused K/V projection weights (bf16)
                      + L * L * 2                # out-proj weight (bf16)
                      + 3 * L * 4)               # biases (f32)
    io = 2 * tb * S * E * 2 + 2 * tb * Q * L * 4  # double-buffered x block + output block
    inter = (tb * S * L * (2 * 4 + 4 * 2)         # k/v f32 + bf16 + head-split copies
             + H * tb * Q * S * (4 + 4 + 2)       # scores, exp, bf16 probs
             + tb * Q * L * (4 + 2 + 4))          # ctx concat f32/bf16, out f32
    return weights + io + int(1.5 * inter)


def _choose_batch_block(B, S, E, Q, L, H, budget_bytes, single_buffer):
    """Largest divisor of B that fits the VMEM budget, keeping grid length >= 2
    (so both v7x TensorCores get work; costs ~nothing on 1-TC v5e/v6e)."""
    max_tb = B // 2 if B >= 2 else B
    best = 1
    for d in range(1, B + 1):
        if B % d or d > max_tb:
            continue
        if _step_vmem_bytes(d, S, E, Q, L, H, single_buffer) <= budget_bytes:
            best = d
    return best


def perceiver_resampler(x, params, num_heads):
    # TODO(synk): key_padding_mask not implemented (module forward exercised with
    # mask=None); attention dropout is inference-mode identity.
    B, S, E = x.shape
    Q, L = params["query"].shape
    assert L % num_heads == 0
    H = num_heads
    Dh = L // H
    out_dtype = x.dtype
    f32, bf16 = jnp.float32, jnp.bfloat16

    # --- Algebraic fusion of the two-stage K/V projections (f32 product, bf16 cast;
    # biases folded too, kept in f32).
    wk_in = params["wk_in"].astype(f32)
    wv_in = params["wv_in"].astype(f32)
    wk_f = (params["wk_ext"].astype(f32) @ wk_in).astype(bf16)
    wv_f = (params["wv_ext"].astype(f32) @ wv_in).astype(bf16)
    bk_f = params["bk_ext"].astype(f32) @ wk_in + params["bk_in"].astype(f32)
    bv_f = params["bv_ext"].astype(f32) @ wv_in + params["bv_in"].astype(f32)

    # --- Hoisted, pre-scaled latent-query in-projection (batch invariant).
    q_proj = (params["query"].astype(f32) @ params["wq_in"].astype(f32)
              + params["bq_in"].astype(f32)) / math.sqrt(Dh)
    q_heads = q_proj.reshape(Q, H, Dh).transpose(1, 0, 2)                 # (H, Q, Dh)

    x_b = x.astype(bf16)
    wo = params["wo"].astype(bf16)
    bo = params["bo"].astype(f32)

    # --- Generation-aware VMEM budget (leave headroom for Mosaic scratch).
    vmem_cap = _vmem_capacity_bytes()
    vmem_limit = max(32 << 20, min(int(vmem_cap * 0.75), 112 << 20))
    budget = int(vmem_limit * 0.8)

    def _run(single_buffer):
        TB = _choose_batch_block(B, S, E, Q, L, H, budget, single_buffer)
        grid = (B // TB,)
        # Pre-tile queries to the kernel's (H*TB, Q, Dh) batch layout (index h*TB + b).
        q_bh = jnp.repeat(q_heads, TB, axis=0).astype(bf16)

        def const_spec(shape):
            kw = {"pipeline_mode": pl.Buffered(1)} if single_buffer else {}
            return pl.BlockSpec(shape, lambda i: (0,) * len(shape), **kw)

        in_specs = [
            pl.BlockSpec((TB, S, E), lambda i: (i, 0, 0)),   # x: TB batch rows / step
            const_spec((H * TB, Q, Dh)),                      # pre-projected, tiled queries
            const_spec((E, L)), const_spec((1, L)),           # fused K projection W, b
            const_spec((E, L)), const_spec((1, L)),           # fused V projection W, b
            const_spec((L, L)), const_spec((1, L)),           # MHA out_proj W, b
        ]
        out_specs = pl.BlockSpec((TB, Q, L), lambda i: (i, 0, 0))

        flops = (2 * B * S * E * L * 2            # fused K and V projections
                 + 2 * B * H * Q * S * Dh * 2     # QK^T and PV
                 + 2 * B * Q * L * L)             # out projection
        bytes_accessed = (x_b.size * 2 + q_bh.size * 2 + 2 * E * L * 2 + L * L * 2
                          + 3 * L * 4 + B * Q * L * jnp.dtype(out_dtype).itemsize)
        cost = pl.CostEstimate(flops=flops, transcendentals=B * H * Q * S,
                               bytes_accessed=bytes_accessed)

        out = pl.pallas_call(
            functools.partial(_resampler_kernel, H, Dh),
            out_shape=jax.ShapeDtypeStruct((B, Q, L), out_dtype),
            grid=grid,
            in_specs=in_specs,
            out_specs=out_specs,
            compiler_params=pltpu.CompilerParams(
                dimension_semantics=("parallel",),
                vmem_limit_bytes=vmem_limit),
            cost_estimate=cost,
        )(x_b, q_bh, wk_f, bk_f, wv_f, bv_f, wo, bo)
        return jax.block_until_ready(out)

    try:
        # Single-buffer the grid-invariant weight blocks (halves their VMEM footprint;
        # matters most on v7x's 64 MiB/TC).
        return _run(single_buffer=True)
    except Exception:
        # Fallback for Pallas builds that reject pipeline_mode=pl.Buffered(1).
        return _run(single_buffer=False)


def reference(x, params, num_heads):
    """Pure-JAX f32 reference implementation of the same forward pass."""
    k_ext = x @ params["wk_ext"] + params["bk_ext"]
    v_ext = x @ params["wv_ext"] + params["bv_ext"]
    q = params["query"] @ params["wq_in"] + params["bq_in"]        # (Q, L)
    k = k_ext @ params["wk_in"] + params["bk_in"]                  # (B, S, L)
    v = v_ext @ params["wv_in"] + params["bv_in"]                  # (B, S, L)
    B, S, L = k.shape
    Q = q.shape[0]
    H = num_heads
    Dh = L // H
    qh = q.reshape(Q, H, Dh)
    kh = k.reshape(B, S, H, Dh)
    vh = v.reshape(B, S, H, Dh)
    s = jnp.einsum("qhd,bshd->bhqs", qh, kh) / math.sqrt(Dh)
    p = jax.nn.softmax(s, axis=-1)
    ctx = jnp.einsum("bhqs,bshd->bqhd", p, vh).reshape(B, Q, L)
    return ctx @ params["wo"] + params["bo"]


def init_params(key, embed_dim, latent_dim, num_queries):
    ks = jax.random.split(key, 16)
    n = lambda k, shape, s=0.02: (s * jax.random.normal(k, shape)).astype(jnp.float32)
    return {
        "query":  jax.random.normal(ks[0], (num_queries, latent_dim)).astype(jnp.float32),
        "wk_ext": n(ks[1], (embed_dim, latent_dim)),
        "bk_ext": n(ks[2], (1, latent_dim)),
        "wv_ext": n(ks[3], (embed_dim, latent_dim)),
        "bv_ext": n(ks[4], (1, latent_dim)),
        "wq_in":  n(ks[5], (latent_dim, latent_dim)),
        "bq_in":  n(ks[6], (1, latent_dim)),
        "wk_in":  n(ks[7], (latent_dim, latent_dim)),
        "bk_in":  n(ks[8], (1, latent_dim)),
        "wv_in":  n(ks[9], (latent_dim, latent_dim)),
        "bv_in":  n(ks[10], (1, latent_dim)),
        "wo":     n(ks[11], (latent_dim, latent_dim)),
        "bo":     n(ks[12], (1, latent_dim)),
    }


if __name__ == "__main__":
    # Small shapes consistent with the module's forward:
    #   x: (batch=2, seq_len=16, embed_dim=32), latent_dim=32,
    #   num_queries=8, num_heads=4  (latent_dim % num_heads == 0).
    B, S, E = 2, 16, 32
    L, Q, H = 32, 8, 4

    root = jax.random.PRNGKey(0)
    kx, kp = jax.random.split(root)
    x = jax.random.normal(kx, (B, S, E), dtype=jnp.float32)
    params = init_params(kp, E, L, Q)

    out = jax.block_until_ready(perceiver_resampler(x, params, H))
    ref = jax.block_until_ready(reference(x, params, H))
    assert out.shape == (B, Q, L), out.shape
    # bf16 matmul operands (f32 accumulation) => relaxed tolerance vs f32 reference.
    assert jnp.allclose(out, ref, rtol=2e-2, atol=2e-2), float(jnp.max(jnp.abs(out - ref)))

    print("KERNEL_OK")
</pallas_src>

<mosaic_0001>
module attributes {stable_mosaic.version = 11 : i64} {
  func.func @_resampler_kernel(%arg0: i32, %arg1: memref<1x16x32xbf16, #tpu.memory_space<vmem>>, %arg2: memref<4x8x8xbf16, #tpu.memory_space<vmem>>, %arg3: memref<32x32xbf16, #tpu.memory_space<vmem>>, %arg4: memref<1x32xf32, #tpu.memory_space<vmem>>, %arg5: memref<32x32xbf16, #tpu.memory_space<vmem>>, %arg6: memref<1x32xf32, #tpu.memory_space<vmem>>, %arg7: memref<32x32xbf16, #tpu.memory_space<vmem>>, %arg8: memref<1x32xf32, #tpu.memory_space<vmem>>, %arg9: memref<1x8x32xf32, #tpu.memory_space<vmem>>) attributes {dimension_semantics = [#tpu.dimension_semantics<parallel>], iteration_bounds = array<i64: 2>, scalar_prefetch = 0 : i64, scratch_operands = 0 : i64, tpu.core_type = #tpu.core_type<tc>, window_params = [{transform_indices = @transform_0, window_bounds = array<i64: 1, 16, 32>}, {pipeline_mode = #tpu.pipeline_mode<synchronous>, transform_indices = @transform_1, window_bounds = array<i64: 4, 8, 8>}, {pipeline_mode = #tpu.pipeline_mode<synchronous>, transform_indices = @transform_2, window_bounds = array<i64: 32, 32>}, {pipeline_mode = #tpu.pipeline_mode<synchronous>, transform_indices = @transform_3, window_bounds = array<i64: 1, 32>}, {pipeline_mode = #tpu.pipeline_mode<synchronous>, transform_indices = @transform_4, window_bounds = array<i64: 32, 32>}, {pipeline_mode = #tpu.pipeline_mode<synchronous>, transform_indices = @transform_5, window_bounds = array<i64: 1, 32>}, {pipeline_mode = #tpu.pipeline_mode<synchronous>, transform_indices = @transform_6, window_bounds = array<i64: 32, 32>}, {pipeline_mode = #tpu.pipeline_mode<synchronous>, transform_indices = @transform_7, window_bounds = array<i64: 1, 32>}, {transform_indices = @transform_8, window_bounds = array<i64: 1, 8, 32>}]} {
    %c0 = arith.constant 0 : index
    %c0_0 = arith.constant 0 : index
    %c0_1 = arith.constant 0 : index
    %0 = vector.load %arg1[%c0, %c0_0, %c0_1] : memref<1x16x32xbf16, #tpu.memory_space<vmem>>, vector<1x16x32xbf16>
    %1 = vector.shape_cast %0 : vector<1x16x32xbf16> to vector<16x32xbf16>
    %c0_2 = arith.constant 0 : index
    %c0_3 = arith.constant 0 : index
    %2 = vector.load %arg3[%c0_2, %c0_3] : memref<32x32xbf16, #tpu.memory_space<vmem>>, vector<32x32xbf16>
    %cst = arith.constant dense<0.000000e+00> : vector<16x32xf32>
    %3 = tpu.matmul %1, %2, %cst {dimension_numbers = #tpu.dot_dimension_numbers<[1], [0], [0], [1], [0, 0, 1, 1], [], []>} : vector<16x32xbf16>, vector<32x32xbf16>, vector<16x32xf32> -> vector<16x32xf32>
    %c0_4 = arith.constant 0 : index
    %c0_5 = arith.constant 0 : index
    %4 = vector.load %arg4[%c0_4, %c0_5] : memref<1x32xf32, #tpu.memory_space<vmem>>, vector<1x32xf32>
    %5 = vector.broadcast %4 : vector<1x32xf32> to vector<16x32xf32>
    %6 = arith.addf %3, %5 : vector<16x32xf32>
    %c0_6 = arith.constant 0 : index
    %c0_7 = arith.constant 0 : index
    %7 = vector.load %arg5[%c0_6, %c0_7] : memref<32x32xbf16, #tpu.memory_space<vmem>>, vector<32x32xbf16>
    %cst_8 = arith.constant dense<0.000000e+00> : vector<16x32xf32>
    %8 = tpu.matmul %1, %7, %cst_8 {dimension_numbers = #tpu.dot_dimension_numbers<[1], [0], [0], [1], [0, 0, 1, 1], [], []>} : vector<16x32xbf16>, vector<32x32xbf16>, vector<16x32xf32> -> vector<16x32xf32>
    %c0_9 = arith.constant 0 : index
    %c0_10 = arith.constant 0 : index
    %9 = vector.load %arg6[%c0_9, %c0_10] : memref<1x32xf32, #tpu.memory_space<vmem>>, vector<1x32xf32>
    %10 = vector.broadcast %9 : vector<1x32xf32> to vector<16x32xf32>
    %11 = arith.addf %8, %10 : vector<16x32xf32>
    %12 = arith.truncf %6 : vector<16x32xf32> to vector<16x32xbf16>
    %13 = vector.shape_cast %12 : vector<16x32xbf16> to vector<1x16x32xbf16>
    %14 = arith.truncf %11 : vector<16x32xf32> to vector<16x32xbf16>
    %15 = vector.shape_cast %14 : vector<16x32xbf16> to vector<1x16x32xbf16>
    %16 = vector.extract_strided_slice %13 {offsets = [0, 0, 0], sizes = [1, 16, 8], strides = [1, 1, 1]} : vector<1x16x32xbf16> to vector<1x16x8xbf16>
    %17 = vector.extract_strided_slice %13 {offsets = [0, 0, 8], sizes = [1, 16, 8], strides = [1, 1, 1]} : vector<1x16x32xbf16> to vector<1x16x8xbf16>
    %18 = vector.extract_strided_slice %13 {offsets = [0, 0, 16], sizes = [1, 16, 8], strides = [1, 1, 1]} : vector<1x16x32xbf16> to vector<1x16x8xbf16>
    %19 = vector.extract_strided_slice %13 {offsets = [0, 0, 24], sizes = [1, 16, 8], strides = [1, 1, 1]} : vector<1x16x32xbf16> to vector<1x16x8xbf16>
    %20 = tpu.concatenate %16, %17, %18, %19 in 0 : vector<1x16x8xbf16>, vector<1x16x8xbf16>, vector<1x16x8xbf16>, vector<1x16x8xbf16> -> vector<4x16x8xbf16>
    %21 = vector.extract_strided_slice %15 {offsets = [0, 0, 0], sizes = [1, 16, 8], strides = [1, 1, 1]} : vector<1x16x32xbf16> to vector<1x16x8xbf16>
    %22 = vector.extract_strided_slice %15 {offsets = [0, 0, 8], sizes = [1, 16, 8], strides = [1, 1, 1]} : vector<1x16x32xbf16> to vector<1x16x8xbf16>
    %23 = vector.extract_strided_slice %15 {offsets = [0, 0, 16], sizes = [1, 16, 8], strides = [1, 1, 1]} : vector<1x16x32xbf16> to vector<1x16x8xbf16>
    %24 = vector.extract_strided_slice %15 {offsets = [0, 0, 24], sizes = [1, 16, 8], strides = [1, 1, 1]} : vector<1x16x32xbf16> to vector<1x16x8xbf16>
    %25 = tpu.concatenate %21, %22, %23, %24 in 0 : vector<1x16x8xbf16>, vector<1x16x8xbf16>, vector<1x16x8xbf16>, vector<1x16x8xbf16> -> vector<4x16x8xbf16>
    %c0_11 = arith.constant 0 : index
    %c0_12 = arith.constant 0 : index
    %c0_13 = arith.constant 0 : index
    %26 = vector.load %arg2[%c0_11, %c0_12, %c0_13] : memref<4x8x8xbf16, #tpu.memory_space<vmem>>, vector<4x8x8xbf16>
    "tpu.trace_start"() <{level = 10 : i32, message = "bqd,bkd->bqk"}> : () -> ()
    %cst_14 = arith.constant dense<0.000000e+00> : vector<4x8x16xf32>
    %27 = tpu.matmul %26, %20, %cst_14 {dimension_numbers = #tpu.dot_dimension_numbers<[2], [2], [1], [1], [0, 0, 0, 1, 1, 1], [0], [0]>} : vector<4x8x8xbf16>, vector<4x16x8xbf16>, vector<4x8x16xf32> -> vector<4x8x16xf32>
    "tpu.trace_stop"() : () -> ()
    %cst_15 = arith.constant dense<0xFF800000> : vector<4x8xf32>
    %28 = vector.multi_reduction <maximumf>, %27, %cst_15 [2] : vector<4x8x16xf32> to vector<4x8xf32>
    %29 = vector.shape_cast %28 : vector<4x8xf32> to vector<4x8x1xf32>
    %30 = vector.broadcast %29 : vector<4x8x1xf32> to vector<4x8x16xf32>
    %31 = arith.subf %27, %30 : vector<4x8x16xf32>
    %32 = math.exp %31 : vector<4x8x16xf32>
    %cst_16 = arith.constant dense<0.000000e+00> : vector<4x8xf32>
    %33 = vector.multi_reduction <add>, %32, %cst_16 [2] : vector<4x8x16xf32> to vector<4x8xf32>
    %34 = vector.shape_cast %33 : vector<4x8xf32> to vector<4x8x1xf32>
    %35 = tpu.reciprocal %34 {approx = true} : vector<4x8x1xf32> -> vector<4x8x1xf32>
    %36 = vector.broadcast %35 : vector<4x8x1xf32> to vector<4x8x16xf32>
    %37 = arith.mulf %32, %36 : vector<4x8x16xf32>
    %38 = arith.truncf %37 : vector<4x8x16xf32> to vector<4x8x16xbf16>
    "tpu.trace_start"() <{level = 10 : i32, message = "bqk,bkd->bqd"}> : () -> ()
    %cst_17 = arith.constant dense<0.000000e+00> : vector<4x8x8xf32>
    %39 = tpu.matmul %38, %25, %cst_17 {dimension_numbers = #tpu.dot_dimension_numbers<[2], [1], [1], [2], [0, 0, 0, 1, 1, 2], [0], [0]>} : vector<4x8x16xbf16>, vector<4x16x8xbf16>, vector<4x8x8xf32> -> vector<4x8x8xf32>
    "tpu.trace_stop"() : () -> ()
    %40 = vector.extract_strided_slice %39 {offsets = [0, 0, 0], sizes = [1, 8, 8], strides = [1, 1, 1]} : vector<4x8x8xf32> to vector<1x8x8xf32>
    %41 = vector.extract_strided_slice %39 {offsets = [1, 0, 0], sizes = [1, 8, 8], strides = [1, 1, 1]} : vector<4x8x8xf32> to vector<1x8x8xf32>
    %42 = vector.extract_strided_slice %39 {offsets = [2, 0, 0], sizes = [1, 8, 8], strides = [1, 1, 1]} : vector<4x8x8xf32> to vector<1x8x8xf32>
    %43 = vector.extract_strided_slice %39 {offsets = [3, 0, 0], sizes = [1, 8, 8], strides = [1, 1, 1]} : vector<4x8x8xf32> to vector<1x8x8xf32>
    %44 = tpu.concatenate %40, %41, %42, %43 in 2 : vector<1x8x8xf32>, vector<1x8x8xf32>, vector<1x8x8xf32>, vector<1x8x8xf32> -> vector<1x8x32xf32>
    %45 = vector.shape_cast %44 : vector<1x8x32xf32> to vector<8x32xf32>
    %46 = arith.truncf %45 : vector<8x32xf32> to vector<8x32xbf16>
    %c0_18 = arith.constant 0 : index
    %c0_19 = arith.constant 0 : index
    %47 = vector.load %arg7[%c0_18, %c0_19] : memref<32x32xbf16, #tpu.memory_space<vmem>>, vector<32x32xbf16>
    %cst_20 = arith.constant dense<0.000000e+00> : vector<8x32xf32>
    %48 = tpu.matmul %46, %47, %cst_20 {dimension_numbers = #tpu.dot_dimension_numbers<[1], [0], [0], [1], [0, 0, 1, 1], [], []>} : vector<8x32xbf16>, vector<32x32xbf16>, vector<8x32xf32> -> vector<8x32xf32>
    %c0_21 = arith.constant 0 : index
    %c0_22 = arith.constant 0 : index
    %49 = vector.load %arg8[%c0_21, %c0_22] : memref<1x32xf32, #tpu.memory_space<vmem>>, vector<1x32xf32>
    %50 = vector.broadcast %49 : vector<1x32xf32> to vector<8x32xf32>
    %51 = arith.addf %48, %50 : vector<8x32xf32>
    %52 = vector.shape_cast %51 : vector<8x32xf32> to vector<1x8x32xf32>
    %c0_23 = arith.constant 0 : index
    %c0_24 = arith.constant 0 : index
    %c0_25 = arith.constant 0 : index
    %53 = vector.load %arg9[%c0_23, %c0_24, %c0_25] : memref<1x8x32xf32, #tpu.memory_space<vmem>>, vector<1x8x32xf32>
    tpu.vector_store %arg9[%c0_23, %c0_24, %c0_25], %52 {strides = array<i32>} : memref<1x8x32xf32, #tpu.memory_space<vmem>>, vector<1x8x32xf32>,
    return
  }
  func.func @transform_0(%arg0: i32) -> (i32, i32, i32) {
    %c0_i32 = arith.constant 0 : i32
    %c0_i32_0 = arith.constant 0 : i32
    %c0_i32_1 = arith.constant 0 : i32
    return %arg0, %c0_i32, %c0_i32_0 : i32, i32, i32
  }
  func.func @transform_1(%arg0: i32) -> (i32, i32, i32) {
    %c0_i32 = arith.constant 0 : i32
    %c0_i32_0 = arith.constant 0 : i32
    %c0_i32_1 = arith.constant 0 : i32
    %c0_i32_2 = arith.constant 0 : i32
    return %c0_i32, %c0_i32_0, %c0_i32_1 : i32, i32, i32
  }
  func.func @transform_2(%arg0: i32) -> (i32, i32) {
    %c0_i32 = arith.constant 0 : i32
    %c0_i32_0 = arith.constant 0 : i32
    %c0_i32_1 = arith.constant 0 : i32
    return %c0_i32, %c0_i32_0 : i32, i32
  }
  func.func @transform_3(%arg0: i32) -> (i32, i32) {
    %c0_i32 = arith.constant 0 : i32
    %c0_i32_0 = arith.constant 0 : i32
    %c0_i32_1 = arith.constant 0 : i32
    return %c0_i32, %c0_i32_0 : i32, i32
  }
  func.func @transform_4(%arg0: i32) -> (i32, i32) {
    %c0_i32 = arith.constant 0 : i32
    %c0_i32_0 = arith.constant 0 : i32
    %c0_i32_1 = arith.constant 0 : i32
    return %c0_i32, %c0_i32_0 : i32, i32
  }
  func.func @transform_5(%arg0: i32) -> (i32, i32) {
    %c0_i32 = arith.constant 0 : i32
    %c0_i32_0 = arith.constant 0 : i32
    %c0_i32_1 = arith.constant 0 : i32
    return %c0_i32, %c0_i32_0 : i32, i32
  }
  func.func @transform_6(%arg0: i32) -> (i32, i32) {
    %c0_i32 = arith.constant 0 : i32
    %c0_i32_0 = arith.constant 0 : i32
    %c0_i32_1 = arith.constant 0 : i32
    return %c0_i32, %c0_i32_0 : i32, i32
  }
  func.func @transform_7(%arg0: i32) -> (i32, i32) {
    %c0_i32 = arith.constant 0 : i32
    %c0_i32_0 = arith.constant 0 : i32
    %c0_i32_1 = arith.constant 0 : i32
    return %c0_i32, %c0_i32_0 : i32, i32
  }
  func.func @transform_8(%arg0: i32) -> (i32, i32, i32) {
    %c0_i32 = arith.constant 0 : i32
    %c0_i32_0 = arith.constant 0 : i32
    %c0_i32_1 = arith.constant 0 : i32
    return %arg0, %c0_i32, %c0_i32_0 : i32, i32, i32
  }
}

module attributes {stable_mosaic.version = 11 : i64} {
  func.func @_resampler_kernel(%arg0: i32, %arg1: memref<1x16x32xbf16, #tpu.memory_space<vmem>>, %arg2: memref<4x8x8xbf16, #tpu.memory_space<vmem>>, %arg3: memref<32x32xbf16, #tpu.memory_space<vmem>>, %arg4: memref<1x32xf32, #tpu.memory_space<vmem>>, %arg5: memref<32x32xbf16, #tpu.memory_space<vmem>>, %arg6: memref<1x32xf32, #tpu.memory_space<vmem>>, %arg7: memref<32x32xbf16, #tpu.memory_space<vmem>>, %arg8: memref<1x32xf32, #tpu.memory_space<vmem>>, %arg9: memref<1x8x32xf32, #tpu.memory_space<vmem>>) attributes {dimension_semantics = [#tpu.dimension_semantics<parallel>], iteration_bounds = array<i64: 2>, scalar_prefetch = 0 : i64, scratch_operands = 0 : i64, tpu.core_type = #tpu.core_type<tc>, window_params = [{transform_indices = @transform_0, window_bounds = array<i64: 1, 16, 32>}, {pipeline_mode = #tpu.pipeline_mode<synchronous>, transform_indices = @transform_1, window_bounds = array<i64: 4, 8, 8>}, {pipeline_mode = #tpu.pipeline_mode<synchronous>, transform_indices = @transform_2, window_bounds = array<i64: 32, 32>}, {pipeline_mode = #tpu.pipeline_mode<synchronous>, transform_indices = @transform_3, window_bounds = array<i64: 1, 32>}, {pipeline_mode = #tpu.pipeline_mode<synchronous>, transform_indices = @transform_4, window_bounds = array<i64: 32, 32>}, {pipeline_mode = #tpu.pipeline_mode<synchronous>, transform_indices = @transform_5, window_bounds = array<i64: 1, 32>}, {pipeline_mode = #tpu.pipeline_mode<synchronous>, transform_indices = @transform_6, window_bounds = array<i64: 32, 32>}, {pipeline_mode = #tpu.pipeline_mode<synchronous>, transform_indices = @transform_7, window_bounds = array<i64: 1, 32>}, {transform_indices = @transform_8, window_bounds = array<i64: 1, 8, 32>}]} {
    %c0 = arith.constant 0 : index
    %c0_0 = arith.constant 0 : index
    %c0_1 = arith.constant 0 : index
    %0 = vector.load %arg1[%c0, %c0_0, %c0_1] : memref<1x16x32xbf16, #tpu.memory_space<vmem>>, vector<1x16x32xbf16>
    %1 = vector.shape_cast %0 : vector<1x16x32xbf16> to vector<16x32xbf16>
    %c0_2 = arith.constant 0 : index
    %c0_3 = arith.constant 0 : index
    %2 = vector.load %arg3[%c0_2, %c0_3] : memref<32x32xbf16, #tpu.memory_space<vmem>>, vector<32x32xbf16>
    %cst = arith.constant dense<0.000000e+00> : vector<16x32xf32>
    %3 = tpu.matmul %1, %2, %cst {dimension_numbers = #tpu.dot_dimension_numbers<[1], [0], [0], [1], [0, 0, 1, 1], [], []>} : vector<16x32xbf16>, vector<32x32xbf16>, vector<16x32xf32> -> vector<16x32xf32>
    %c0_4 = arith.constant 0 : index
    %c0_5 = arith.constant 0 : index
    %4 = vector.load %arg4[%c0_4, %c0_5] : memref<1x32xf32, #tpu.memory_space<vmem>>, vector<1x32xf32>
    %5 = vector.broadcast %4 : vector<1x32xf32> to vector<16x32xf32>
    %6 = arith.addf %3, %5 : vector<16x32xf32>
    %c0_6 = arith.constant 0 : index
    %c0_7 = arith.constant 0 : index
    %7 = vector.load %arg5[%c0_6, %c0_7] : memref<32x32xbf16, #tpu.memory_space<vmem>>, vector<32x32xbf16>
    %cst_8 = arith.constant dense<0.000000e+00> : vector<16x32xf32>
    %8 = tpu.matmul %1, %7, %cst_8 {dimension_numbers = #tpu.dot_dimension_numbers<[1], [0], [0], [1], [0, 0, 1, 1], [], []>} : vector<16x32xbf16>, vector<32x32xbf16>, vector<16x32xf32> -> vector<16x32xf32>
    %c0_9 = arith.constant 0 : index
    %c0_10 = arith.constant 0 : index
    %9 = vector.load %arg6[%c0_9, %c0_10] : memref<1x32xf32, #tpu.memory_space<vmem>>, vector<1x32xf32>
    %10 = vector.broadcast %9 : vector<1x32xf32> to vector<16x32xf32>
    %11 = arith.addf %8, %10 : vector<16x32xf32>
    %12 = arith.truncf %6 : vector<16x32xf32> to vector<16x32xbf16>
    %13 = vector.shape_cast %12 : vector<16x32xbf16> to vector<1x16x32xbf16>
    %14 = arith.truncf %11 : vector<16x32xf32> to vector<16x32xbf16>
    %15 = vector.shape_cast %14 : vector<16x32xbf16> to vector<1x16x32xbf16>
    %16 = vector.extract_strided_slice %13 {offsets = [0, 0, 0], sizes = [1, 16, 8], strides = [1, 1, 1]} : vector<1x16x32xbf16> to vector<1x16x8xbf16>
    %17 = vector.extract_strided_slice %13 {offsets = [0, 0, 8], sizes = [1, 16, 8], strides = [1, 1, 1]} : vector<1x16x32xbf16> to vector<1x16x8xbf16>
    %18 = vector.extract_strided_slice %13 {offsets = [0, 0, 16], sizes = [1, 16, 8], strides = [1, 1, 1]} : vector<1x16x32xbf16> to vector<1x16x8xbf16>
    %19 = vector.extract_strided_slice %13 {offsets = [0, 0, 24], sizes = [1, 16, 8], strides = [1, 1, 1]} : vector<1x16x32xbf16> to vector<1x16x8xbf16>
    %20 = tpu.concatenate %16, %17, %18, %19 in 0 : vector<1x16x8xbf16>, vector<1x16x8xbf16>, vector<1x16x8xbf16>, vector<1x16x8xbf16> -> vector<4x16x8xbf16>
    %21 = vector.extract_strided_slice %15 {offsets = [0, 0, 0], sizes = [1, 16, 8], strides = [1, 1, 1]} : vector<1x16x32xbf16> to vector<1x16x8xbf16>
    %22 = vector.extract_strided_slice %15 {offsets = [0, 0, 8], sizes = [1, 16, 8], strides = [1, 1, 1]} : vector<1x16x32xbf16> to vector<1x16x8xbf16>
    %23 = vector.extract_strided_slice %15 {offsets = [0, 0, 16], sizes = [1, 16, 8], strides = [1, 1, 1]} : vector<1x16x32xbf16> to vector<1x16x8xbf16>
    %24 = vector.extract_strided_slice %15 {offsets = [0, 0, 24], sizes = [1, 16, 8], strides = [1, 1, 1]} : vector<1x16x32xbf16> to vector<1x16x8xbf16>
    %25 = tpu.concatenate %21, %22, %23, %24 in 0 : vector<1x16x8xbf16>, vector<1x16x8xbf16>, vector<1x16x8xbf16>, vector<1x16x8xbf16> -> vector<4x16x8xbf16>
    %c0_11 = arith.constant 0 : index
    %c0_12 = arith.constant 0 : index
    %c0_13 = arith.constant 0 : index
    %26 = vector.load %arg2[%c0_11, %c0_12, %c0_13] : memref<4x8x8xbf16, #tpu.memory_space<vmem>>, vector<4x8x8xbf16>
    "tpu.trace_start"() <{level = 10 : i32, message = "bqd,bkd->bqk"}> : () -> ()
    %cst_14 = arith.constant dense<0.000000e+00> : vector<4x8x16xf32>
    %27 = tpu.matmul %26, %20, %cst_14 {dimension_numbers = #tpu.dot_dimension_numbers<[2], [2], [1], [1], [0, 0, 0, 1, 1, 1], [0], [0]>} : vector<4x8x8xbf16>, vector<4x16x8xbf16>, vector<4x8x16xf32> -> vector<4x8x16xf32>
    "tpu.trace_stop"() : () -> ()
    %cst_15 = arith.constant dense<0xFF800000> : vector<4x8xf32>
    %28 = vector.multi_reduction <maximumf>, %27, %cst_15 [2] : vector<4x8x16xf32> to vector<4x8xf32>
    %29 = vector.shape_cast %28 : vector<4x8xf32> to vector<4x8x1xf32>
    %30 = vector.broadcast %29 : vector<4x8x1xf32> to vector<4x8x16xf32>
    %31 = arith.subf %27, %30 : vector<4x8x16xf32>
    %32 = math.exp %31 : vector<4x8x16xf32>
    %cst_16 = arith.constant dense<0.000000e+00> : vector<4x8xf32>
    %33 = vector.multi_reduction <add>, %32, %cst_16 [2] : vector<4x8x16xf32> to vector<4x8xf32>
    %34 = vector.shape_cast %33 : vector<4x8xf32> to vector<4x8x1xf32>
    %35 = tpu.reciprocal %34 {approx = true} : vector<4x8x1xf32> -> vector<4x8x1xf32>
    %36 = vector.broadcast %35 : vector<4x8x1xf32> to vector<4x8x16xf32>
    %37 = arith.mulf %32, %36 : vector<4x8x16xf32>
    %38 = arith.truncf %37 : vector<4x8x16xf32> to vector<4x8x16xbf16>
    "tpu.trace_start"() <{level = 10 : i32, message = "bqk,bkd->bqd"}> : () -> ()
    %cst_17 = arith.constant dense<0.000000e+00> : vector<4x8x8xf32>
    %39 = tpu.matmul %38, %25, %cst_17 {dimension_numbers = #tpu.dot_dimension_numbers<[2], [1], [1], [2], [0, 0, 0, 1, 1, 2], [0], [0]>} : vector<4x8x16xbf16>, vector<4x16x8xbf16>, vector<4x8x8xf32> -> vector<4x8x8xf32>
    "tpu.trace_stop"() : () -> ()
    %40 = vector.extract_strided_slice %39 {offsets = [0, 0, 0], sizes = [1, 8, 8], strides = [1, 1, 1]} : vector<4x8x8xf32> to vector<1x8x8xf32>
    %41 = vector.extract_strided_slice %39 {offsets = [1, 0, 0], sizes = [1, 8, 8], strides = [1, 1, 1]} : vector<4x8x8xf32> to vector<1x8x8xf32>
    %42 = vector.extract_strided_slice %39 {offsets = [2, 0, 0], sizes = [1, 8, 8], strides = [1, 1, 1]} : vector<4x8x8xf32> to vector<1x8x8xf32>
    %43 = vector.extract_strided_slice %39 {offsets = [3, 0, 0], sizes = [1, 8, 8], strides = [1, 1, 1]} : vector<4x8x8xf32> to vector<1x8x8xf32>
    %44 = tpu.concatenate %40, %41, %42, %43 in 2 : vector<1x8x8xf32>, vector<1x8x8xf32>, vector<1x8x8xf32>, vector<1x8x8xf32> -> vector<1x8x32xf32>
    %45 = vector.shape_cast %44 : vector<1x8x32xf32> to vector<8x32xf32>
    %46 = arith.truncf %45 : vector<8x32xf32> to vector<8x32xbf16>
    %c0_18 = arith.constant 0 : index
    %c0_19 = arith.constant 0 : index
    %47 = vector.load %arg7[%c0_18, %c0_19] : memref<32x32xbf16, #tpu.memory_space<vmem>>, vector<32x32xbf16>
    %cst_20 = arith.constant dense<0.000000e+00> : vector<8x32xf32>
    %48 = tpu.matmul %46, %47, %cst_20 {dimension_numbers = #tpu.dot_dimension_numbers<[1], [0], [0], [1], [0, 0, 1, 1], [], []>} : vector<8x32xbf16>, vector<32x32xbf16>, vector<8x32xf32> -> vector<8x32xf32>
    %c0_21 = arith.constant 0 : index
    %c0_22 = arith.constant 0 : index
    %49 = vector.load %arg8[%c0_21, %c0_22] : memref<1x32xf32, #tpu.memory_space<vmem>>, vector<1x32xf32>
    %50 = vector.broadcast %49 : vector<1x32xf32> to vector<8x32xf32>
    %51 = arith.addf %48, %50 : vector<8x32xf32>
    %52 = vector.shape_cast %51 : vector<8x32xf32> to vector<1x8x32xf32>
    %c0_23 = arith.constant 0 : index
    %c0_24 = arith.constant 0 : index
    %c0_25 = arith.constant 0 : index
    %53 = vector.load %arg9[%c0_23, %c0_24, %c0_25] : memref<1x8x32xf32, #tpu.memory_space<vmem>>, vector<1x8x32xf32>
    tpu.vector_store %arg9[%c0_23, %c0_24, %c0_25], %52 {strides = array<i32>} : memref<1x8x32xf32, #tpu.memory_space<vmem>>, vector<1x8x32xf32>,
    return
  }
  func.func @transform_0(%arg0: i32) -> (i32, i32, i32) {
    %c0_i32 = arith.constant 0 : i32
    %c0_i32_0 = arith.constant 0 : i32
    %c0_i32_1 = arith.constant 0 : i32
    return %arg0, %c0_i32, %c0_i32_0 : i32, i32, i32
  }
  func.func @transform_1(%arg0: i32) -> (i32, i32, i32) {
    %c0_i32 = arith.constant 0 : i32
    %c0_i32_0 = arith.constant 0 : i32
    %c0_i32_1 = arith.constant 0 : i32
    %c0_i32_2 = arith.constant 0 : i32
    return %c0_i32, %c0_i32_0, %c0_i32_1 : i32, i32, i32
  }
  func.func @transform_2(%arg0: i32) -> (i32, i32) {
    %c0_i32 = arith.constant 0 : i32
    %c0_i32_0 = arith.constant 0 : i32
    %c0_i32_1 = arith.constant 0 : i32
    return %c0_i32, %c0_i32_0 : i32, i32
  }
  func.func @transform_3(%arg0: i32) -> (i32, i32) {
    %c0_i32 = arith.constant 0 : i32
    %c0_i32_0 = arith.constant 0 : i32
    %c0_i32_1 = arith.constant 0 : i32
    return %c0_i32, %c0_i32_0 : i32, i32
  }
  func.func @transform_4(%arg0: i32) -> (i32, i32) {
    %c0_i32 = arith.constant 0 : i32
    %c0_i32_0 = arith.constant 0 : i32
    %c0_i32_1 = arith.constant 0 : i32
    return %c0_i32, %c0_i32_0 : i32, i32
  }
  func.func @transform_5(%arg0: i32) -> (i32, i32) {
    %c0_i32 = arith.constant 0 : i32
    %c0_i32_0 = arith.constant 0 : i32
    %c0_i32_1 = arith.constant 0 : i32
    return %c0_i32, %c0_i32_0 : i32, i32
  }
  func.func @transform_6(%arg0: i32) -> (i32, i32) {
    %c0_i32 = arith.constant 0 : i32
    %c0_i32_0 = arith.constant 0 : i32
    %c0_i32_1 = arith.constant 0 : i32
    return %c0_i32, %c0_i32_0 : i32, i32
  }
  func.func @transform_7(%arg0: i32) -> (i32, i32) {
    %c0_i32 = arith.constant 0 : i32
    %c0_i32_0 = arith.constant 0 : i32
    %c0_i32_1 = arith.constant 0 : i32
    return %c0_i32, %c0_i32_0 : i32, i32
  }
  func.func @transform_8(%arg0: i32) -> (i32, i32, i32) {
    %c0_i32 = arith.constant 0 : i32
    %c0_i32_0 = arith.constant 0 : i32
    %c0_i32_1 = arith.constant 0 : i32
    return %arg0, %c0_i32, %c0_i32_0 : i32, i32, i32
  }
}

</mosaic_0001>

<bundles_post_ra>
// kernel: tpu_custom_call.1
= control target key start
LH: loop header
LB: loop body
LE: loop exit
PB: predicated region body
PF: predicated region fallthrough
CT: control target
= control target key end

     0   :  { %s1992_s0 = inlined_call_operand.hbm [shape: bf16[2,16,32], index: 0, kind: input, shape index: {}]   ;;  %s1993_s1 = inlined_call_operand.hbm [shape: bf16[4,8,8], index: 1, kind: input, shape index: {}]   ;;  %s1994_s2 = inlined_call_operand.hbm [shape: bf16[32,32], index: 2, kind: input, shape index: {}]   ;;  %s1995_s3 = inlined_call_operand.vmem [shape: f32[1,32], index: 3, kind: input, shape index: {}]   ;;  %s1996_s4 = inlined_call_operand.hbm [shape: bf16[32,32], index: 4, kind: input, shape index: {}]   ;;  %s1997_s5 = inlined_call_operand.vmem [shape: f32[1,32], index: 5, kind: input, shape index: {}]   ;;  %s1998_s6 = inlined_call_operand.hbm [shape: bf16[32,32], index: 6, kind: input, shape index: {}]   ;;  %s1999_s7 = inlined_call_operand.vmem [shape: f32[1,32], index: 7, kind: input, shape index: {}]   ;;  %s2000_s8 = inlined_call_operand.hbm [shape: f32[2,8,32], index: 8, kind: output, shape index: {}]  }
   0x1   :  { %2007 = sst [smem:[#allocation16_spill]] %s1993_s1 }
   0x2   :  { %2008 = sst [smem:[#allocation17_spill]] %s1994_s2 }
   0x3   :  { %13 = vsyncpa [#allocation3], 0 }
   0x4   :  { %15 = vsyncpa [#allocation3 + $0x1], 0 }
   0x5   :  { %16 = vsyncpa [#allocation6], 0 }
   0x6   :  { %17 = vsyncpa [#allocation9], 0 }
   0x7   :  { %18 = vsyncpa [#allocation4], 0 }
   0x8   :  { %20 = vsyncpa [#allocation4 + $0x1], 0  ;;  %s1684_s27 = smov 0   ;;  %s1686_s28 = smov 0  }
   0x9   :  { %s1688_s29 = smov 0   ;;  %s1690_s30 = smov 0  }
   0xa LB: > { %s1705_s9 = sadd.s32 4294967295, %s1621_s30   ;;  %s1157_s10 = sadd.s32 4294967294, %s1621_s30   ;;  %s1621_s30 = sphi %s1690_s30, %s2031_s30   ;;  %s1617_s29 = sphi %s1688_s29, %s2030_s29   ;;  %s1613_s28 = sphi %s1686_s28, %s2029_s28   ;;  %s1609_s27 = sphi %s1684_s27, %s2028_s27  }
   0xb   : > { %p46_p0 = scmp.ne.s32.totalorder %s1613_s28, %s1609_s27  ;;  %p2001_p1 = scmp.eq.s32.totalorder %s1705_s9, 0 }
   0xc   : > { %p217_p2 = scmp.eq.s32.totalorder %s1705_s9, 1  ;;  %p223_p3 = scmp.eq.s32.totalorder %s1157_s10, 1 }
   0xd   : > { %p1714_p4 = por %p2001_p1, %p46_p0  ;;  %p1158_p5 = scmp.ge.s32.totalorder %s1621_s30, 1 }
   0xe   : > { %p1719_p6 = por %p223_p3, %p46_p0  ;;  %p230_p7 = scmp.lt.s32.totalorder %s1621_s30, 3 }
   0xf   : > { %s2009_s11 = scalar_select %p1714_p4, 1, 0 }
  0x10   : > { %s2010_s12 = scalar_select %p1719_p6, 1, 0 }
  0x11   : > { %p1724_p8 = pnand %p1158_p5, %p230_p7  ;;  %s1623_s14 = smov [#allocation5]  }
  0x12   : > { %s242_s15 = sshll.u32 %s1623_s14, 4  ;;  %s1624_s17 = smov [#allocation8]   ;;  %s243_s15 = int_to_ptr.vmem [resolvable:$true] %s242_s15 }
  0x13   : > { %s2011_s13 = scalar_select %p1724_p8, 1, 0 }
  0x14   : > { %p1317_p9 = pneg %p1724_p8  ;;  %s271_s18 = sshll.u32 %s1624_s17, 4  ;;  %s272_s18 = int_to_ptr.vmem [resolvable:$true] %s271_s18 }
  0x15   : > { %s1625_s19 = smov [#allocation7]   ;;  %s1428_s21 = scalar_lea.vmem %s243_s15, 256 }
  0x16   : > { %p1733_p11 = pnand %p1317_p9, %p2001_p1  ;;  %s255_s20 = sshll.u32 %s1625_s19, 4  ;;  %s256_s20 = int_to_ptr.vmem [resolvable:$true] %s255_s20 }
  0x17   : > { %p1429_p13 = scmp.ne.s32.totalorder %s243_s15, %s1428_s21  ;;  %p1436_p5 = scmp.lt.s32.totalorder %s243_s15, %s243_s15 }
  0x18   : > { %p1419_p12 = pneg %p1733_p11  ;;  %p1437_p7 = scmp.lt.s32.totalorder %s1428_s21, %s1428_s21 }
  0x1a   : > { %p1431_p0 = pnand %p1429_p13, %p1419_p12  ;;  %p1438_p9 = por %p1437_p7, %p1436_p5 }
  0x1c   : > { %p1432_p3 = pneg %p1431_p0 }
  0x1e   : > { %p1439_p10 = pnand %p1438_p9, %p1432_p3 }
  0x20   : > { %1442 = shalt.err (!%p1439_p10)
}
  0x21   : > { %s2002_s22 = smov 64   ;;  %s2003_s23 = smov 4  }
  0x22   : > { %s2013_s1 = sld [smem:[#allocation16_spill]]  ;;  %s1454_s26 = scalar_lea.vmem %s272_s18, 256 }
  0x23   : > { %p1455_p13 = scmp.ne.s32.totalorder %s272_s18, %s1454_s26  ;;  %p1462_p3 = scmp.lt.s32.totalorder %s272_s18, %s272_s18 }
  0x24   : > { %p1463_p10 = scmp.lt.s32.totalorder %s1454_s26, %s1454_s26 }
  0x25   : > { %p1457_p0 = pnand %p1455_p13, %p1419_p12 }
  0x26   : > { %p1464_p7 = por %p1463_p10, %p1462_p3 }
  0x27   : > { %p1458_p5 = pneg %p1457_p0 }
  0x28   : > { %1320 = dma.hbm_to_vmem [thread:$0]  (!%p1733_p11), %s2013_s1, 256, %s243_s15, [#allocation6], %s2002_s22, %s2002_s22, %s2003_s23  }
  0x29   : > { %p1465_p9 = pnand %p1464_p7, %p1458_p5 }
  0x2b   : > { %1468 = shalt.err (!%p1465_p9)
}
  0x2c   : > { %1326 = dma.hbm_to_vmem [thread:$0]  (!%p1733_p11), %s1996_s4, 256, %s272_s18, [#allocation9], %s2002_s22, %s2002_s22, %s2003_s23  }
  0x2d   : > { %s1480_s15 = scalar_lea.vmem %s256_s20, 256  ;;  %p1488_p3 = scmp.lt.s32.totalorder %s256_s20, %s256_s20 }
  0x2e   : > { %p1481_p1 = scmp.ne.s32.totalorder %s256_s20, %s1480_s15  ;;  %p1489_p5 = scmp.lt.s32.totalorder %s1480_s15, %s1480_s15 }
  0x30   : > { %p1483_p13 = pnand %p1481_p1, %p1419_p12  ;;  %p1490_p10 = por %p1489_p5, %p1488_p3 }
  0x32   : > { %p1484_p0 = pneg %p1483_p13 }
  0x34   : > { %p1491_p7 = pnand %p1490_p10, %p1484_p0 }
  0x36   : > { %1494 = shalt.err (!%p1491_p7)
}
  0x37   : > { %s2014_s2 = sld [smem:[#allocation17_spill]]  ;;  %s1628_s18 = smov [#allocation10]  }
  0x38   : > { %s287_s21 = sshll.u32 %s1628_s18, 4  ;;  %s288_s21 = int_to_ptr.vmem [resolvable:$true] %s287_s21 }
  0x39   : > { %s1506_s24 = scalar_lea.vmem %s288_s21, 256  ;;  %p1514_p0 = scmp.lt.s32.totalorder %s288_s21, %s288_s21 }
  0x3a   : > { %p1507_p1 = scmp.ne.s32.totalorder %s288_s21, %s1506_s24  ;;  %p1515_p3 = scmp.lt.s32.totalorder %s1506_s24, %s1506_s24 }
  0x3c   : > { %p1509_p9 = pnand %p1507_p1, %p1419_p12  ;;  %p1516_p5 = por %p1515_p3, %p1514_p0 }
  0x3d   : > { %1323 = dma.hbm_to_vmem [thread:$0]  (!%p1733_p11), %s2014_s2, 256, %s256_s20, [#allocation6], %s2002_s22, %s2002_s22, %s2003_s23  }
  0x3e   : > { %p1510_p13 = pneg %p1509_p9 }
  0x40   : > { %p1517_p10 = pnand %p1516_p5, %p1510_p13 }
  0x42   : > { %1520 = shalt.err (!%p1517_p10)
}
  0x43   : > { %1329 = dma.hbm_to_vmem [thread:$0]  (!%p1733_p11), %s1998_s6, 256, %s288_s21, [#allocation9], %s2002_s22, %s2002_s22, %s2003_s23  }
  0x44   : > { %s1784_s26 = sadd.s32 1, %s1621_s30   ;;  %s33_s16 = sadd.s32 1, %s1617_s29 }
  0x45   : > { %s30_s10 = ssub.s32 %s1621_s30, %s1784_s26  ;;  %p40_p12 = scmp.ne.s32.totalorder %s1617_s29, %s1613_s28 }
  0x46   : > { %p31_p7 = scmp.eq.s32.totalorder %s30_s10, 0  ;;  %p41_p1 = scmp.eq.s32.totalorder %s1621_s30, 0 }
  0x47   : > { %p1794_p9 = por %p217_p2, %p40_p12  ;;  %p1342_p13 = scmp.lt.s32.totalorder %s1621_s30, 2 }
  0x48   : > { %s1800_s15 = scalar_select %p31_p7, %s1617_s29, %s33_s16  }
  0x49   : > { %s2015_s14 = scalar_select %p1794_p9, 1, 0 }
  0x4a   : > { %p42_p0 = por %p41_p1, %p40_p12  ;;  %s304_s17 = sand.u32 1, %s1617_s29  }
  0x4b   : > { %s1164_s19 = sshll.u32 %s304_s17, 3  ;;  %s1199_s18 = sshll.u32 %s1621_s30, 7 }
  0x4c   : > { %s1807_s20 = scalar_lea.hbm %s1992_s0, %s1199_s18  ;;  %s308_s25 = scalar_lea.vmem [#allocation2], %s1164_s19 }
  0x4d   : > { %s315_s10 = sshll.u32 %s308_s25, 4  ;;  %p1811_p2 = pnand %p1342_p13, %p42_p0  ;;  %s1809_s10 = int_to_ptr.vmem [resolvable:$true] %s315_s10 }
  0x4e   : > { %s1815_s16 = scalar_lea.sflag [#allocation3], %s304_s17  ;;  %s1521_s23 = scalar_lea.hbm %s1807_s20, 128 }
  0x4f   : > { %p1522_p11 = scmp.ne.s32.totalorder %s1807_s20, %s1521_s23  ;;  %p1523_p3 = pneg %p1811_p2 }
  0x50   : > { %s1526_s19 = scalar_lea.hbm %s1992_s0, 256  ;;  %p1527_p12 = scmp.lt.s32.totalorder %s1807_s20, %s1992_s0 }
  0x51   : > { %p1524_p5 = pnand %p1523_p3, %p1522_p11  ;;  %p1528_p7 = scmp.lt.s32.totalorder %s1526_s19, %s1521_s23 }
  0x53   : > { %p1525_p10 = pneg %p1524_p5  ;;  %p1529_p1 = por %p1528_p7, %p1527_p12 }
  0x55   : > { %p1530_p13 = pnand %p1529_p1, %p1525_p10 }
  0x57   : > { %1533 = shalt.err (!%p1530_p13)
}
  0x58   : > { %s1534_s17 = scalar_lea.vmem %s1809_s10, 128  ;;  %s1629_s1 = smov [#allocation2]  }
  0x59   : > { %p1535_p0 = scmp.ne.s32.totalorder %s1809_s10, %s1534_s17  ;;  %s1539_s2 = sshll.u32 %s1629_s1, 4  ;;  %s1540_s2 = int_to_ptr.vmem [resolvable:$false] %s1539_s2 }
  0x5a   : > { %s1541_s18 = scalar_lea.vmem %s1540_s2, 256  ;;  %p1542_p5 = scmp.lt.s32.totalorder %s1809_s10, %s1540_s2 }
  0x5b   : > { %p1537_p6 = pnand %p1535_p0, %p1523_p3  ;;  %p1543_p9 = scmp.lt.s32.totalorder %s1541_s18, %s1534_s17 }
  0x5d   : > { %p1538_p11 = pneg %p1537_p6  ;;  %p1544_p4 = por %p1543_p9, %p1542_p5 }
  0x5f   : > { %p1545_p8 = pnand %p1544_p4, %p1538_p11 }
  0x61   : > { %1548 = shalt.err (!%p1545_p8)
}
  0x62   : > { %s2017_s23 = smov 4   ;;  %s2018_s21 = smov 64  }
  0x63   : > { %1333 = dma.hbm_to_vmem [thread:$0]  (!%p1811_p2), %s1807_s20, 128, %s1809_s10, %s1815_s16, %s2018_s21, %s2018_s21, %s2017_s23  }
  0x64   : > { %p2019_p6 = scmp.ne.s32.totalorder %s2011_s13, 0 }
  0x65   : > { %s1842_s1 = sand.u32 (!%p2019_p6), 1, %s1613_s28   ;;  %p2020_p4 = scmp.ne.s32.totalorder (!%p2019_p6), %s2009_s11, 0 }
  0x66   : > { %327 = sbr.rel (%p2019_p6) target bundleno = 1528 (0x5f8), region = 52  ;;  %s1168_s2 = sshll.u32 (!%p2019_p6), %s1842_s1, 3 }
  0x67   : > { %s330_s19 = scalar_lea.sflag (!%p2019_p6), [#allocation3], %s1842_s1  ;;  %s333_s22 = scalar_lea.vmem (!%p2019_p6), [#allocation2], %s1168_s2 }
  0x6b   : > { %1592 = dma.done.wait (%p2020_p4), %s330_s19, 128  }
  0x6c   : > { %1594 = vsyncadd (%p2020_p4), %s330_s19, 4294967168  ;;  %p2021_p8 = scmp.eq.s32.totalorder %s1705_s9, 0 }
  0x6e   : > { %1596 = dma.done.wait (%p2021_p8), [#allocation6], 512   ;;  %p2022_p9 = pmov %p2021_p8 }
  0x6f   : > { %p2023_p2 = pmov %p2021_p8 }
  0x70   : > { %1598 = vsyncadd (%p2022_p9), [#allocation6], 4294966784 }
  0x71   : > { %1600 = dma.done.wait (%p2023_p2), [#allocation9], 512   ;;  %p2024_p3 = pmov %p2023_p2 }
  0x72   : > { %v1630_v0 = vmov 0.0   ;;  %vm1631_vm0 = vmmov 0   ;;  %v1394_v1 = vld [vmem:[#allocation7 + $0x8] sm:$0xff]   ;;  %v1395_v2 = vld [vmem:[#allocation7] sm:$0xff]   ;;  %vm413_vm1 = vcmask 261120   ;;  %v1397_v4 = vld [vmem:[#allocation8 + $0x8] sm:$0xff]  }
  0x73   : > { %1602 = vsyncadd (%p2024_p3), [#allocation9], 4294966784  ;;  %1225 = vmatprep.subr.bf16.mxu0 %v1630_v0  ;;  %1229 = vmatprep.mubr.msk.bf16.mxu0 %vm1631_vm0, %v1630_v0  ;;  %v1396_v3 = vld [vmem:[%s333_s22] sm:$0xff]   ;;  %v1398_v5 = vld [vmem:[#allocation8] sm:$0xff]   ;;  %vm545_vm2 = vcmask 64512   ;;  %s1632_s20 = smov 104  }
  0x74   : > { %1233 = vmatprep.subr.bf16.mxu1 %v1630_v0  ;;  %1237 = vmatprep.mubr.msk.bf16.mxu1 %vm1631_vm0, %v1630_v0  ;;  %v1174_v7 = vld [vmem:[%s1995_s3] ss:$0 sm:$0xff]  ;;  %s1633_s10 = smov 120   ;;  %s1634_s16 = smov 112   ;;  %v541_v15 = vld [vmem:[#allocation5] sm:$0xf] }
  0x75   : > { %1226 = vmatpush3.bf16.msra.mxu0 %v1394_v1  ;;  %1234 = vmatpush3.bf16.msra.mxu1 %v1397_v4  ;;  %v1179_v22 = vld [vmem:[%s1997_s5] ss:$0 sm:$0xff]  ;;  %v542_v26 = vld [vmem:[#allocation5 + $0x4] sm:$0xf]  ;;  %v543_v30 = vld [vmem:[#allocation5 + $0x8] sm:$0xf] }
  0x76   : > { %1227 = vmatprep.subr.bf16.mxu0 %v1630_v0  ;;  %1235 = vmatprep.subr.bf16.mxu1 %v1630_v0  ;;  %v544_v32 = vld [vmem:[#allocation5 + $0xc] sm:$0xf]  ;;  %vm730_vm3 = vcmask 130048   ;;  %s1635_s17 = smov 8   ;;  %s1636_s18 = smov 16   ;;  %vm965_vm4 = vcmask 195584  }
  0x77   : > { %s1637_s23 = smov 24   ;;  %s1196_s22 = sshll.u32 %s1705_s9, 7 }
  0x78   : > { %s381_s11 = scalar_lea.vmem [#allocation11], %s1168_s2  ;;  %s1036_s9 = scalar_lea.sflag [#allocation4], %s1842_s1 }
  0x79   : > { %1228 = vmatpush3.bf16.msra.mxu0 %v1395_v2  ;;  %1236 = vmatpush3.bf16.msra.mxu1 %v1398_v5  ;;  %s1049_s13 = sshll.u32 %s381_s11, 4  ;;  %p2025_p12 = scmp.ne.s32.totalorder %s2015_s14, 0  ;;  %s1950_s13 = int_to_ptr.vmem [resolvable:$true] %s1049_s13 }
  0x7a   : > { %1241 = vmatprep.subr.bf16.mxu0 %v1630_v0  ;;  %1247 = vmatprep.subr.bf16.mxu1 %v1630_v0  ;;  %s1549_s24 = scalar_lea.vmem %s1950_s13, 128  ;;  %s1638_s2 = smov [#allocation11]  }
  0x7b   : > { %p1550_p10 = scmp.ne.s32.totalorder %s1950_s13, %s1549_s24  ;;  %s1553_s25 = sshll.u32 %s1638_s2, 4  ;;  %s1554_s25 = int_to_ptr.vmem [resolvable:$false] %s1553_s25 }
  0x7c   : > { %1230 = vmatmul.mubr.msk.bf16.vlgmr.msra.gmra.mxu0 %vm413_vm1, %v1396_v3  ;;  %1238 = vmatmul.mubr.msk.bf16.vlgmr.msra.gmra.mxu1 %vm413_vm1, %v1396_v3  ;;  %p1556_p13 = scmp.lt.s32.totalorder %s1950_s13, %s1554_s25 }
  0x7d   : > { %1243 = vmatprep.mubr.msk.bf16.mxu0 %vm1631_vm0, %v1630_v0  ;;  %1249 = vmatprep.mubr.msk.bf16.mxu1 %vm1631_vm0, %v1630_v0  ;;  %p1551_p7 = pnand %p1550_p10, %p2025_p12 }
  0x7f   : > { %p1552_p1 = pneg %p1551_p7 }
 0x13c   : > { %v451_v6 = vpop.f32.mrf.mxu0  ;;  %v515_v16 = vpop.f32.mrf.mxu1 }
 0x13d   : > { %v452_v10 = vadd.f32 %v1174_v7, %v451_v6  ;;  %v516_v27 = vadd.f32 %v1179_v22, %v515_v16 }
 0x13e   : > { %v1231_v8 = vpop.f32.mrf.mxu0  ;;  %v1239_v17 = vpop.f32.mrf.mxu1 }
 0x140   : > { %v454_v9 = vpop.f32.mrf.mxu0  ;;  %v518_v18 = vpop.f32.mrf.mxu1 }
 0x141   : > { %v455_v11 = vadd.f32 %v1174_v7, %v454_v9  ;;  %v519_v28 = vadd.f32 %v1179_v22, %v518_v18 }
 0x142   : > { %v1232_v12 = vpop.f32.mrf.mxu0  ;;  %v1240_v19 = vpop.f32.mrf.mxu1 }
 0x143   : > { %v522_v13 = vpack.c.bf16 %v455_v11, %v452_v10  ;;  %v1898_v31 = vpack.c.bf16 %v519_v28, %v516_v27 }
 0x145   : > { %529 = vrot.lane.b32.xlu1 %v522_v13, %s1632_s20  ;;  %525 = vrot.lane.b32.xlu0 %v522_v13, %s1633_s10  ;;  %v550_v14 = vsel %vm545_vm2, %v522_v13, 0 }
 0x146   : > { %1242 = vmatpush3.bf16.xpose.msra.mxu0 %v550_v14 }
 0x147   : > { %1253 = vmatprep.subr.bf16.mxu0 %v1630_v0 }
 0x149   : > { %527 = vrot.lane.b32.xlu0 %v522_v13, %s1634_s16 }
 0x14d   : > { %1244 = vmatmul.mubr.msk.bf16.vlgmr.msra.gmra.mxu0 %vm545_vm2, %v541_v15 }
 0x14e   : > { %1255 = vmatprep.mubr.msk.bf16.mxu0 %vm1631_vm0, %v1630_v0 }
 0x1b7   : > { %v526_v20 = vpop.permute.xlu0 %525  ;;  %v530_v25 = vpop.permute.xlu1 %529 }
 0x1b8   : > { %v596_v21 = vsel %vm545_vm2, %v526_v20, 0  ;;  %v688_v29 = vsel %vm545_vm2, %v530_v25, 0 }
 0x1b9   : > { %1248 = vmatpush3.bf16.xpose.msra.mxu1 %v596_v21 }
 0x1ba   : > { %1259 = vmatprep.subr.bf16.mxu1 %v1630_v0 }
 0x1bb   : > { %v528_v23 = vpop.permute.xlu0 %527 }
 0x1bc   : > { %v642_v24 = vsel %vm545_vm2, %v528_v23, 0 }
 0x1bd   : > { %1254 = vmatpush3.bf16.xpose.msra.mxu0 %v642_v24 }
 0x1be   : > { %1265 = vmatprep.subr.bf16.mxu0 %v1630_v0 }
 0x1c0   : > { %1250 = vmatmul.mubr.msk.bf16.vlgmr.msra.gmra.mxu1 %vm545_vm2, %v542_v26 }
 0x1c1   : > { %1260 = vmatpush3.bf16.xpose.msra.mxu1 %v688_v29  ;;  %1261 = vmatprep.mubr.msk.bf16.mxu1 %vm1631_vm0, %v1630_v0 }
 0x1c2   : > { %1271 = vmatprep.subr.bf16.mxu1 %v1630_v0 }
 0x1c4   : > { %1256 = vmatmul.mubr.msk.bf16.vlgmr.msra.gmra.mxu0 %vm545_vm2, %v543_v30 }
 0x1c5   : > { %1266 = vmatpush3.bf16.msra.mxu0 %v1898_v31  ;;  %1267 = vmatprep.mubr.msk.bf16.mxu0 %vm1631_vm0, %v1630_v0 }
 0x1c6   : > { %1277 = vmatprep.subr.bf16.mxu0 %v1630_v0 }
 0x1c8   : > { %1262 = vmatmul.mubr.msk.bf16.vlgmr.msra.gmra.mxu1 %vm545_vm2, %v544_v32 }
 0x1c9   : > { %1273 = vmatprep.mubr.msk.bf16.mxu1 %vm1631_vm0, %v1630_v0 }
 0x20d   : > { %v586_v33 = vpop.f32.mrf.mxu0 }
 0x20e   : > { %v731_v34 = vsel %vm730_vm3, %v586_v33, -inf }
 0x20f   : > { %732 = vmax.xlane.f32.xlu1 %v731_v34  ;;  %v1245_v35 = vpop.f32.mrf.mxu0 }
 0x211   : > { %v589_v36 = vpop.f32.mrf.mxu0 }
 0x213   : > { %v1246_v37 = vpop.f32.mrf.mxu0 }
 0x280   : > { %v632_v38 = vpop.f32.mrf.mxu1 }
 0x281   : > { %v734_v39 = vsel %vm730_vm3, %v632_v38, -inf }
 0x282   : > { %735 = vmax.xlane.f32.xlu0 %v734_v39  ;;  %v1251_v40 = vpop.f32.mrf.mxu1 }
 0x284   : > { %v635_v41 = vpop.f32.mrf.mxu1  ;;  %v678_v42 = vpop.f32.mrf.mxu0 }
 0x285   : > { %v737_v43 = vsel %vm730_vm3, %v678_v42, -inf }
 0x286   : > { %v1252_v44 = vpop.f32.mrf.mxu1  ;;  %738 = vmax.xlane.f32.xlu0 %v737_v43  ;;  %v1257_v45 = vpop.f32.mrf.mxu0 }
 0x288   : > { %v724_v46 = vpop.f32.mrf.mxu1  ;;  %v681_v47 = vpop.f32.mrf.mxu0 }
 0x289   : > { %v740_v48 = vsel %vm730_vm3, %v724_v46, -inf }
 0x28a   : > { %741 = vmax.xlane.f32.xlu1 %v740_v48  ;;  %v1263_v49 = vpop.f32.mrf.mxu1  ;;  %v1258_v50 = vpop.f32.mrf.mxu0 }
 0x28c   : > { %v727_v51 = vpop.f32.mrf.mxu1 }
 0x28e   : > { %v1264_v52 = vpop.f32.mrf.mxu1 }
 0x298   : > { %v733_v53 = vpop.xlane.xlu1 %732 }
 0x299   : > { %v743_v54 = vsub.f32 %v586_v33, %v733_v53  ;;  %v1399_v33 = vld [vmem:[#allocation10 + $0x8] sm:$0xff]   ;;  %v1191_v53 = vld [vmem:[%s1999_s7] ss:$0 sm:$0xff] }
 0x29b   : > { %v747_v55 = vmul.f32 1.442695, %v743_v54 }
 0x29d   : > { %1401 = vpow2.f32 %v747_v55 }
 0x2aa   : > { %v1402_v56 = vpop.eup %1401 }
 0x2ab   : > { %v755_v57 = vsel %vm730_vm3, %v1402_v56, 0.0 }
 0x2ac   : > { %756 = vadd.xlane.f32.xlu0 %v755_v57 }
 0x30b   : > { %v736_v58 = vpop.xlane.xlu0 %735 }
 0x30c   : > { %v744_v59 = vsub.f32 %v632_v38, %v736_v58 }
 0x30e   : > { %v749_v60 = vmul.f32 1.442695, %v744_v59 }
 0x30f   : > { %v739_v61 = vpop.xlane.xlu0 %738 }
 0x310   : > { %1403 = vpow2.f32 %v749_v60  ;;  %v745_v62 = vsub.f32 %v678_v42, %v739_v61  ;;  %v1400_v42 = vld [vmem:[#allocation10] sm:$0xff]  }
 0x312   : > { %v751_v63 = vmul.f32 1.442695, %v745_v62 }
 0x313   : > { %v742_v6 = vpop.xlane.xlu1 %741 }
 0x314   : > { %1405 = vpow2.f32 %v751_v63  ;;  %v746_v7 = vsub.f32 %v724_v46, %v742_v6 }
 0x316   : > { %v753_v8 = vmul.f32 1.442695, %v746_v7 }
 0x31d   : > { %v1404_v1 = vpop.eup %1403 }
 0x31e   : > { %v758_v2 = vsel %vm730_vm3, %v1404_v1, 0.0 }
 0x31f   : > { %759 = vadd.xlane.f32.xlu1 %v758_v2 }
 0x321   : > { %v1406_v3 = vpop.eup %1405 }
 0x322   : > { %v761_v4 = vsel %vm730_vm3, %v1406_v3, 0.0 }
 0x323   : > { %762 = vadd.xlane.f32.xlu0 %v761_v4 }
 0x330   : > { %535 = vrot.lane.b32.xlu1 %v1898_v31, %s1634_s16  ;;  %s1948_s16 = scalar_lea.hbm %s2000_s8, %s1196_s22 }
 0x335   : > { %v757_v5 = vpop.xlane.xlu0 %756 }
 0x336   : > { %1407 = vrcp.f32 %v757_v5 }
 0x337   : > { %1409 = vpow2.f32 %v753_v8 }
 0x339   : > { %532 = vrot.lane.b32.xlu0 %v1898_v31, %s1633_s10 }
 0x343   : > { %v1408_v9 = vpop.eup %1407 }
 0x344   : > { %v771_v10 = vmul.f32 %v1408_v9, %v1402_v56  ;;  %v1410_v12 = vpop.eup %1409 }
 0x345   : > { %v764_v13 = vsel %vm730_vm3, %v1410_v12, 0.0 }
 0x346   : > { %v775_v11 = vpack.c.bf16 %v771_v10, %v771_v10 }
 0x348   : > { %1268 = vmatmul.mubr.msk.bf16.vlgmr.msra.gmra.mxu0 %vm730_vm3, %v775_v11 }
 0x349   : > { %1279 = vmatprep.mubr.msk.bf16.mxu0 %vm1631_vm0, %v1630_v0 }
 0x354   : > { %765 = vadd.xlane.f32.xlu1 %v764_v13 }
 0x365   : > { %538 = vrot.lane.b32.xlu1 %v1898_v31, %s1632_s20 }
 0x3a8   : > { %v760_v14 = vpop.xlane.xlu1 %759 }
 0x3a9   : > { %1411 = vrcp.f32 %v760_v14 }
 0x3ac   : > { %v536_v15 = vpop.permute.xlu1 %535  ;;  %v763_v16 = vpop.xlane.xlu0 %762 }
 0x3ad   : > { %1413 = vrcp.f32 %v763_v16  ;;  %1278 = vmatpush3.bf16.msra.mxu0 %v536_v15 }
 0x3ae   : > { %1289 = vmatprep.subr.bf16.mxu0 %v1630_v0 }
 0x3b0   : > { %v533_v17 = vpop.permute.xlu0 %532 }
 0x3b1   : > { %1272 = vmatpush3.bf16.msra.mxu1 %v533_v17 }
 0x3b2   : > { %1283 = vmatprep.subr.bf16.mxu1 %v1630_v0 }
 0x3b6   : > { %v1412_v18 = vpop.eup %1411 }
 0x3b7   : > { %v772_v19 = vmul.f32 %v1412_v18, %v1404_v1 }
 0x3b9   : > { %v776_v20 = vpack.c.bf16 %v772_v19, %v772_v19 }
 0x3ba   : > { %v1414_v21 = vpop.eup %1413 }
 0x3bb   : > { %1274 = vmatmul.mubr.msk.bf16.vlgmr.msra.gmra.mxu1 %vm730_vm3, %v776_v20  ;;  %v773_v22 = vmul.f32 %v1414_v21, %v1406_v3 }
 0x3bc   : > { %1285 = vmatprep.mubr.msk.bf16.mxu1 %vm1631_vm0, %v1630_v0 }
 0x3bd   : > { %v777_v23 = vpack.c.bf16 %v773_v22, %v773_v22 }
 0x3bf   : > { %1280 = vmatmul.mubr.msk.bf16.vlgmr.msra.gmra.mxu0 %vm730_vm3, %v777_v23 }
 0x3c0   : > { %1293 = vmatprep.mubr.msk.bf16.mxu0 %vm1631_vm0, %v1630_v0  ;;  %1290 = vmatpush3.bf16.msra.mxu0 %v1399_v33 }
 0x3c1   : > { %1291 = vmatprep.subr.bf16.mxu0 %v1630_v0 }
 0x3c4   : > { %1292 = vmatpush3.bf16.msra.mxu0 %v1400_v42 }
 0x3dd   : > { %v766_v24 = vpop.xlane.xlu1 %765 }
 0x3de   : > { %1415 = vrcp.f32 %v766_v24 }
 0x3e1   : > { %v539_v25 = vpop.permute.xlu1 %538 }
 0x3e2   : > { %1284 = vmatpush3.bf16.msra.mxu1 %v539_v25 }
 0x3eb   : > { %v1416_v26 = vpop.eup %1415 }
 0x3ec   : > { %v774_v27 = vmul.f32 %v1416_v26, %v1410_v12 }
 0x3ee   : > { %v778_v28 = vpack.c.bf16 %v774_v27, %v774_v27 }
 0x3f0   : > { %1286 = vmatmul.mubr.msk.bf16.vlgmr.msra.gmra.mxu1 %vm730_vm3, %v778_v28 }
 0x408   : > { %v816_v29 = vpop.f32.mrf.mxu0 }
 0x40a   : > { %v1269_v30 = vpop.f32.mrf.mxu0 }
 0x40c   : > { %v819_v31 = vpop.f32.mrf.mxu0 }
 0x40e   : > { %v1270_v32 = vpop.f32.mrf.mxu0 }
 0x47b   : > { %v859_v34 = vpop.f32.mrf.mxu1 }
 0x47c   : > { %952 = vrot.lane.b32.xlu0 %v859_v34, %s1635_s17  ;;  %s1555_s17 = scalar_lea.vmem %s1554_s25, 256 }
 0x47d   : > { %v1275_v35 = vpop.f32.mrf.mxu1  ;;  %p1557_p0 = scmp.lt.s32.totalorder %s1555_s17, %s1549_s24 }
 0x47f   : > { %v862_v36 = vpop.f32.mrf.mxu1  ;;  %v902_v37 = vpop.f32.mrf.mxu0  ;;  %p1558_p11 = por %p1557_p0, %p1556_p13 }
 0x480   : > { %956 = vrot.lane.b32.xlu1 %v902_v37, %s1636_s18 }
 0x481   : > { %v1276_v38 = vpop.f32.mrf.mxu1  ;;  %v1281_v39 = vpop.f32.mrf.mxu0  ;;  %p1559_p5 = pnand %p1558_p11, %p1552_p1 }
 0x483   : > { %v905_v40 = vpop.f32.mrf.mxu0 }
 0x485   : > { %v1282_v41 = vpop.f32.mrf.mxu0 }
 0x4b0   : > { %v945_v43 = vpop.f32.mrf.mxu1 }
 0x4b1   : > { %960 = vrot.lane.b32.xlu0 %v945_v43, %s1637_s23 }
 0x4b2   : > { %v1287_v0 = vpop.f32.mrf.mxu1 }
 0x4b4   : > { %v948_v44 = vpop.f32.mrf.mxu1 }
 0x4b6   : > { %v1288_v45 = vpop.f32.mrf.mxu1 }
 0x4ee   : > { %v953_v46 = vpop.permute.xlu0 %952 }
 0x4ef   : > { %v963_v48 = vsel %vm545_vm2, %v816_v29, %v953_v46 }
 0x4f2   : > { %v957_v47 = vpop.permute.xlu1 %956 }
 0x4f3   : > { %v964_v49 = vsel %vm730_vm3, %v963_v48, %v957_v47 }
 0x523   : > { %v961_v50 = vpop.permute.xlu0 %960 }
 0x524   : > { %v966_v51 = vsel %vm965_vm4, %v964_v49, %v961_v50 }
 0x525   : > { %v967_v52 = vpack.c.bf16 %v966_v51, %v966_v51 }
 0x527   : > { %1294 = vmatmul.mubr.msk.bf16.vlgmr.msra.gmra.mxu0 %vm413_vm1, %v967_v52 }
 0x5e7   : > { %v1028_v54 = vpop.f32.mrf.mxu0 }
 0x5e8   : > { %v1029_v55 = vadd.f32 %v1191_v53, %v1028_v54 }
 0x5e9   : > { %v1295_v56 = vpop.f32.mrf.mxu0 }
 0x5ea   : > { %1034 = vst.msk [vmem:[%s381_s11] sm:$0xff] %vm413_vm1, %v1029_v55 }
 0x5eb   : > { %v1031_v57 = vpop.f32.mrf.mxu0 }
 0x5ec   : > { %1562 = shalt.err (!%p1559_p5)
}
 0x5ed   : > { %s1563_s18 = scalar_lea.hbm %s1948_s16, 128  ;;  %s1567_s21 = scalar_lea.hbm %s2000_s8, 256 }
 0x5ee   : > { %p1564_p6 = scmp.ne.s32.totalorder %s1948_s16, %s1563_s18  ;;  %p1568_p9 = scmp.lt.s32.totalorder %s1948_s16, %s2000_s8 }
 0x5ef   : > { %p1569_p2 = scmp.lt.s32.totalorder %s1567_s21, %s1563_s18 }
 0x5f0   : > { %p1565_p4 = pnand %p1564_p6, %p2025_p12 }
 0x5f1   : > { %p1570_p3 = por %p1569_p2, %p1568_p9 }
 0x5f2   : > { %p1566_p8 = pneg %p1565_p4 }
 0x5f4   : > { %p1571_p10 = pnand %p1570_p3, %p1566_p8 }
 0x5f6   : > { %1574 = shalt.err (!%p1571_p10)
}
 0x5f7   : > { %1315 = dma.vmem_to_hbm [thread:$0]  (%p2025_p12), %s1950_s13, 128, %s1948_s16, %s1036_s9   ;;  %v1296_v58 = vpop.f32.mrf.mxu0 }
 0x5f8 PF: > { %s1061_s11 = sand.u32 1, %s1609_s27   ;;  %p2026_p7 = scmp.ne.s32.totalorder %s2010_s12, 0 }
 0x5f9   : > { %p2027_p1 = scmp.ge.s32.totalorder %s1621_s30, 2  ;;  %s1062_s20 = scalar_lea.sflag [#allocation4], %s1061_s11 }
 0x5fb   : > { %p1335_p13 = pnand %p2027_p1, %p2026_p7 }
 0x5fd   : > { %p1336_p0 = pneg %p1335_p13 }
 0x5ff   : > { %1604 = dma.done.wait (%p1336_p0), %s1062_s20, 128  }
 0x600   : > { %1606 = vsyncadd (%p1336_p0), %s1062_s20, 4294967168  ;;  %p23_p11 = scmp.ge.s32.totalorder %s1784_s26, 4   ;;  %s2028_s27 = smov %s1613_s28 }
 0x601   : > { %s2029_s28 = smov %s1617_s29  ;;  %s2030_s29 = smov %s1800_s15 }
 0x602   : > { %s2031_s30 = smov %s1784_s26  ;;  %25 = sbr.rel (!%p23_p11) target bundleno = 10 (0xa), region = 113 }
 0x607   :  { %1067 = vsyncpa [#allocation3], 1 }
 0x608   :  { %1069 = vsyncpa [#allocation3 + $0x1], 1 }
 0x609   :  { %1070 = vsyncpa [#allocation6], 1 }
 0x60a   :  { %1071 = vsyncpa [#allocation9], 1 }
 0x60b   :  { %1072 = vsyncpa [#allocation4], 1 }
 0x60c   :  { %1074 = vsyncpa [#allocation4 + $0x1], 1 }

// kernel: tpu_custom_call.1
= control target key start
LH: loop header
LB: loop body
LE: loop exit
PB: predicated region body
PF: predicated region fallthrough
CT: control target
= control target key end

     0   :  { %s1992_s0 = inlined_call_operand.hbm [shape: bf16[2,16,32], index: 0, kind: input, shape index: {}]   ;;  %s1993_s1 = inlined_call_operand.hbm [shape: bf16[4,8,8], index: 1, kind: input, shape index: {}]   ;;  %s1994_s2 = inlined_call_operand.hbm [shape: bf16[32,32], index: 2, kind: input, shape index: {}]   ;;  %s1995_s3 = inlined_call_operand.vmem [shape: f32[1,32], index: 3, kind: input, shape index: {}]   ;;  %s1996_s4 = inlined_call_operand.hbm [shape: bf16[32,32], index: 4, kind: input, shape index: {}]   ;;  %s1997_s5 = inlined_call_operand.vmem [shape: f32[1,32], index: 5, kind: input, shape index: {}]   ;;  %s1998_s6 = inlined_call_operand.hbm [shape: bf16[32,32], index: 6, kind: input, shape index: {}]   ;;  %s1999_s7 = inlined_call_operand.vmem [shape: f32[1,32], index: 7, kind: input, shape index: {}]   ;;  %s2000_s8 = inlined_call_operand.hbm [shape: f32[2,8,32], index: 8, kind: output, shape index: {}]  }
   0x1   :  { %2007 = sst [smem:[#allocation16_spill]] %s1993_s1 }
   0x2   :  { %2008 = sst [smem:[#allocation17_spill]] %s1994_s2 }
   0x3   :  { %13 = vsyncpa [#allocation3], 0 }
   0x4   :  { %15 = vsyncpa [#allocation3 + $0x1], 0 }
   0x5   :  { %16 = vsyncpa [#allocation6], 0 }
   0x6   :  { %17 = vsyncpa [#allocation9], 0 }
   0x7   :  { %18 = vsyncpa [#allocation4], 0 }
   0x8   :  { %20 = vsyncpa [#allocation4 + $0x1], 0  ;;  %s1684_s27 = smov 0   ;;  %s1686_s28 = smov 0  }
   0x9   :  { %s1688_s29 = smov 0   ;;  %s1690_s30 = smov 0  }
   0xa LB: > { %s1705_s9 = sadd.s32 4294967295, %s1621_s30   ;;  %s1157_s10 = sadd.s32 4294967294, %s1621_s30   ;;  %s1621_s30 = sphi %s1690_s30, %s2031_s30   ;;  %s1617_s29 = sphi %s1688_s29, %s2030_s29   ;;  %s1613_s28 = sphi %s1686_s28, %s2029_s28   ;;  %s1609_s27 = sphi %s1684_s27, %s2028_s27  }
   0xb   : > { %p46_p0 = scmp.ne.s32.totalorder %s1613_s28, %s1609_s27  ;;  %p2001_p1 = scmp.eq.s32.totalorder %s1705_s9, 0 }
   0xc   : > { %p217_p2 = scmp.eq.s32.totalorder %s1705_s9, 1  ;;  %p223_p3 = scmp.eq.s32.totalorder %s1157_s10, 1 }
   0xd   : > { %p1714_p4 = por %p2001_p1, %p46_p0  ;;  %p1158_p5 = scmp.ge.s32.totalorder %s1621_s30, 1 }
   0xe   : > { %p1719_p6 = por %p223_p3, %p46_p0  ;;  %p230_p7 = scmp.lt.s32.totalorder %s1621_s30, 3 }
   0xf   : > { %s2009_s11 = scalar_select %p1714_p4, 1, 0 }
  0x10   : > { %s2010_s12 = scalar_select %p1719_p6, 1, 0 }
  0x11   : > { %p1724_p8 = pnand %p1158_p5, %p230_p7  ;;  %s1623_s14 = smov [#allocation5]  }
  0x12   : > { %s242_s15 = sshll.u32 %s1623_s14, 4  ;;  %s1624_s17 = smov [#allocation8]   ;;  %s243_s15 = int_to_ptr.vmem [resolvable:$true] %s242_s15 }
  0x13   : > { %s2011_s13 = scalar_select %p1724_p8, 1, 0 }
  0x14   : > { %p1317_p9 = pneg %p1724_p8  ;;  %s271_s18 = sshll.u32 %s1624_s17, 4  ;;  %s272_s18 = int_to_ptr.vmem [resolvable:$true] %s271_s18 }
  0x15   : > { %s1625_s19 = smov [#allocation7]   ;;  %s1428_s21 = scalar_lea.vmem %s243_s15, 256 }
  0x16   : > { %p1733_p11 = pnand %p1317_p9, %p2001_p1  ;;  %s255_s20 = sshll.u32 %s1625_s19, 4  ;;  %s256_s20 = int_to_ptr.vmem [resolvable:$true] %s255_s20 }
  0x17   : > { %p1429_p13 = scmp.ne.s32.totalorder %s243_s15, %s1428_s21  ;;  %p1436_p5 = scmp.lt.s32.totalorder %s243_s15, %s243_s15 }
  0x18   : > { %p1419_p12 = pneg %p1733_p11  ;;  %p1437_p7 = scmp.lt.s32.totalorder %s1428_s21, %s1428_s21 }
  0x1a   : > { %p1431_p0 = pnand %p1429_p13, %p1419_p12  ;;  %p1438_p9 = por %p1437_p7, %p1436_p5 }
  0x1c   : > { %p1432_p3 = pneg %p1431_p0 }
  0x1e   : > { %p1439_p10 = pnand %p1438_p9, %p1432_p3 }
  0x20   : > { %1442 = shalt.err (!%p1439_p10)
}
  0x21   : > { %s2002_s22 = smov 64   ;;  %s2003_s23 = smov 4  }
  0x22   : > { %s2013_s1 = sld [smem:[#allocation16_spill]]  ;;  %s1454_s26 = scalar_lea.vmem %s272_s18, 256 }
  0x23   : > { %p1455_p13 = scmp.ne.s32.totalorder %s272_s18, %s1454_s26  ;;  %p1462_p3 = scmp.lt.s32.totalorder %s272_s18, %s272_s18 }
  0x24   : > { %p1463_p10 = scmp.lt.s32.totalorder %s1454_s26, %s1454_s26 }
  0x25   : > { %p1457_p0 = pnand %p1455_p13, %p1419_p12 }
  0x26   : > { %p1464_p7 = por %p1463_p10, %p1462_p3 }
  0x27   : > { %p1458_p5 = pneg %p1457_p0 }
  0x28   : > { %1320 = dma.hbm_to_vmem [thread:$0]  (!%p1733_p11), %s2013_s1, 256, %s243_s15, [#allocation6], %s2002_s22, %s2002_s22, %s2003_s23  }
  0x29   : > { %p1465_p9 = pnand %p1464_p7, %p1458_p5 }
  0x2b   : > { %1468 = shalt.err (!%p1465_p9)
}
  0x2c   : > { %1326 = dma.hbm_to_vmem [thread:$0]  (!%p1733_p11), %s1996_s4, 256, %s272_s18, [#allocation9], %s2002_s22, %s2002_s22, %s2003_s23  }
  0x2d   : > { %s1480_s15 = scalar_lea.vmem %s256_s20, 256  ;;  %p1488_p3 = scmp.lt.s32.totalorder %s256_s20, %s256_s20 }
  0x2e   : > { %p1481_p1 = scmp.ne.s32.totalorder %s256_s20, %s1480_s15  ;;  %p1489_p5 = scmp.lt.s32.totalorder %s1480_s15, %s1480_s15 }
  0x30   : > { %p1483_p13 = pnand %p1481_p1, %p1419_p12  ;;  %p1490_p10 = por %p1489_p5, %p1488_p3 }
  0x32   : > { %p1484_p0 = pneg %p1483_p13 }
  0x34   : > { %p1491_p7 = pnand %p1490_p10, %p1484_p0 }
  0x36   : > { %1494 = shalt.err (!%p1491_p7)
}
  0x37   : > { %s2014_s2 = sld [smem:[#allocation17_spill]]  ;;  %s1628_s18 = smov [#allocation10]  }
  0x38   : > { %s287_s21 = sshll.u32 %s1628_s18, 4  ;;  %s288_s21 = int_to_ptr.vmem [resolvable:$true] %s287_s21 }
  0x39   : > { %s1506_s24 = scalar_lea.vmem %s288_s21, 256  ;;  %p1514_p0 = scmp.lt.s32.totalorder %s288_s21, %s288_s21 }
  0x3a   : > { %p1507_p1 = scmp.ne.s32.totalorder %s288_s21, %s1506_s24  ;;  %p1515_p3 = scmp.lt.s32.totalorder %s1506_s24, %s1506_s24 }
  0x3c   : > { %p1509_p9 = pnand %p1507_p1, %p1419_p12  ;;  %p1516_p5 = por %p1515_p3, %p1514_p0 }
  0x3d   : > { %1323 = dma.hbm_to_vmem [thread:$0]  (!%p1733_p11), %s2014_s2, 256, %s256_s20, [#allocation6], %s2002_s22, %s2002_s22, %s2003_s23  }
  0x3e   : > { %p1510_p13 = pneg %p1509_p9 }
  0x40   : > { %p1517_p10 = pnand %p1516_p5, %p1510_p13 }
  0x42   : > { %1520 = shalt.err (!%p1517_p10)
}
  0x43   : > { %1329 = dma.hbm_to_vmem [thread:$0]  (!%p1733_p11), %s1998_s6, 256, %s288_s21, [#allocation9], %s2002_s22, %s2002_s22, %s2003_s23  }
  0x44   : > { %s1784_s26 = sadd.s32 1, %s1621_s30   ;;  %s33_s16 = sadd.s32 1, %s1617_s29 }
  0x45   : > { %s30_s10 = ssub.s32 %s1621_s30, %s1784_s26  ;;  %p40_p12 = scmp.ne.s32.totalorder %s1617_s29, %s1613_s28 }
  0x46   : > { %p31_p7 = scmp.eq.s32.totalorder %s30_s10, 0  ;;  %p41_p1 = scmp.eq.s32.totalorder %s1621_s30, 0 }
  0x47   : > { %p1794_p9 = por %p217_p2, %p40_p12  ;;  %p1342_p13 = scmp.lt.s32.totalorder %s1621_s30, 2 }
  0x48   : > { %s1800_s15 = scalar_select %p31_p7, %s1617_s29, %s33_s16  }
  0x49   : > { %s2015_s14 = scalar_select %p1794_p9, 1, 0 }
  0x4a   : > { %p42_p0 = por %p41_p1, %p40_p12  ;;  %s304_s17 = sand.u32 1, %s1617_s29  }
  0x4b   : > { %s1164_s19 = sshll.u32 %s304_s17, 3  ;;  %s1199_s18 = sshll.u32 %s1621_s30, 7 }
  0x4c   : > { %s1807_s20 = scalar_lea.hbm %s1992_s0, %s1199_s18  ;;  %s308_s25 = scalar_lea.vmem [#allocation2], %s1164_s19 }
  0x4d   : > { %s315_s10 = sshll.u32 %s308_s25, 4  ;;  %p1811_p2 = pnand %p1342_p13, %p42_p0  ;;  %s1809_s10 = int_to_ptr.vmem [resolvable:$true] %s315_s10 }
  0x4e   : > { %s1815_s16 = scalar_lea.sflag [#allocation3], %s304_s17  ;;  %s1521_s23 = scalar_lea.hbm %s1807_s20, 128 }
  0x4f   : > { %p1522_p11 = scmp.ne.s32.totalorder %s1807_s20, %s1521_s23  ;;  %p1523_p3 = pneg %p1811_p2 }
  0x50   : > { %s1526_s19 = scalar_lea.hbm %s1992_s0, 256  ;;  %p1527_p12 = scmp.lt.s32.totalorder %s1807_s20, %s1992_s0 }
  0x51   : > { %p1524_p5 = pnand %p1523_p3, %p1522_p11  ;;  %p1528_p7 = scmp.lt.s32.totalorder %s1526_s19, %s1521_s23 }
  0x53   : > { %p1525_p10 = pneg %p1524_p5  ;;  %p1529_p1 = por %p1528_p7, %p1527_p12 }
  0x55   : > { %p1530_p13 = pnand %p1529_p1, %p1525_p10 }
  0x57   : > { %1533 = shalt.err (!%p1530_p13)
}
  0x58   : > { %s1534_s17 = scalar_lea.vmem %s1809_s10, 128  ;;  %s1629_s1 = smov [#allocation2]  }
  0x59   : > { %p1535_p0 = scmp.ne.s32.totalorder %s1809_s10, %s1534_s17  ;;  %s1539_s2 = sshll.u32 %s1629_s1, 4  ;;  %s1540_s2 = int_to_ptr.vmem [resolvable:$false] %s1539_s2 }
  0x5a   : > { %s1541_s18 = scalar_lea.vmem %s1540_s2, 256  ;;  %p1542_p5 = scmp.lt.s32.totalorder %s1809_s10, %s1540_s2 }
  0x5b   : > { %p1537_p6 = pnand %p1535_p0, %p1523_p3  ;;  %p1543_p9 = scmp.lt.s32.totalorder %s1541_s18, %s1534_s17 }
  0x5d   : > { %p1538_p11 = pneg %p1537_p6  ;;  %p1544_p4 = por %p1543_p9, %p1542_p5 }
  0x5f   : > { %p1545_p8 = pnand %p1544_p4, %p1538_p11 }
  0x61   : > { %1548 = shalt.err (!%p1545_p8)
}
  0x62   : > { %s2017_s23 = smov 4   ;;  %s2018_s21 = smov 64  }
  0x63   : > { %1333 = dma.hbm_to_vmem [thread:$0]  (!%p1811_p2), %s1807_s20, 128, %s1809_s10, %s1815_s16, %s2018_s21, %s2018_s21, %s2017_s23  }
  0x64   : > { %p2019_p6 = scmp.ne.s32.totalorder %s2011_s13, 0 }
  0x65   : > { %s1842_s1 = sand.u32 (!%p2019_p6), 1, %s1613_s28   ;;  %p2020_p4 = scmp.ne.s32.totalorder (!%p2019_p6), %s2009_s11, 0 }
  0x66   : > { %327 = sbr.rel (%p2019_p6) target bundleno = 1528 (0x5f8), region = 52  ;;  %s1168_s2 = sshll.u32 (!%p2019_p6), %s1842_s1, 3 }
  0x67   : > { %s330_s19 = scalar_lea.sflag (!%p2019_p6), [#allocation3], %s1842_s1  ;;  %s333_s22 = scalar_lea.vmem (!%p2019_p6), [#allocation2], %s1168_s2 }
  0x6b   : > { %1592 = dma.done.wait (%p2020_p4), %s330_s19, 128  }
  0x6c   : > { %1594 = vsyncadd (%p2020_p4), %s330_s19, 4294967168  ;;  %p2021_p8 = scmp.eq.s32.totalorder %s1705_s9, 0 }
  0x6e   : > { %1596 = dma.done.wait (%p2021_p8), [#allocation6], 512   ;;  %p2022_p9 = pmov %p2021_p8 }
  0x6f   : > { %p2023_p2 = pmov %p2021_p8 }
  0x70   : > { %1598 = vsyncadd (%p2022_p9), [#allocation6], 4294966784 }
  0x71   : > { %1600 = dma.done.wait (%p2023_p2), [#allocation9], 512   ;;  %p2024_p3 = pmov %p2023_p2 }
  0x72   : > { %v1630_v0 = vmov 0.0   ;;  %vm1631_vm0 = vmmov 0   ;;  %v1394_v1 = vld [vmem:[#allocation7 + $0x8] sm:$0xff]   ;;  %v1395_v2 = vld [vmem:[#allocation7] sm:$0xff]   ;;  %vm413_vm1 = vcmask 261120   ;;  %v1397_v4 = vld [vmem:[#allocation8 + $0x8] sm:$0xff]  }
  0x73   : > { %1602 = vsyncadd (%p2024_p3), [#allocation9], 4294966784  ;;  %1225 = vmatprep.subr.bf16.mxu0 %v1630_v0  ;;  %1229 = vmatprep.mubr.msk.bf16.mxu0 %vm1631_vm0, %v1630_v0  ;;  %v1396_v3 = vld [vmem:[%s333_s22] sm:$0xff]   ;;  %v1398_v5 = vld [vmem:[#allocation8] sm:$0xff]   ;;  %vm545_vm2 = vcmask 64512   ;;  %s1632_s20 = smov 104  }
  0x74   : > { %1233 = vmatprep.subr.bf16.mxu1 %v1630_v0  ;;  %1237 = vmatprep.mubr.msk.bf16.mxu1 %vm1631_vm0, %v1630_v0  ;;  %v1174_v7 = vld [vmem:[%s1995_s3] ss:$0 sm:$0xff]  ;;  %s1633_s10 = smov 120   ;;  %s1634_s16 = smov 112   ;;  %v541_v15 = vld [vmem:[#allocation5] sm:$0xf] }
  0x75   : > { %1226 = vmatpush3.bf16.msra.mxu0 %v1394_v1  ;;  %1234 = vmatpush3.bf16.msra.mxu1 %v1397_v4  ;;  %v1179_v22 = vld [vmem:[%s1997_s5] ss:$0 sm:$0xff]  ;;  %v542_v26 = vld [vmem:[#allocation5 + $0x4] sm:$0xf]  ;;  %v543_v30 = vld [vmem:[#allocation5 + $0x8] sm:$0xf] }
  0x76   : > { %1227 = vmatprep.subr.bf16.mxu0 %v1630_v0  ;;  %1235 = vmatprep.subr.bf16.mxu1 %v1630_v0  ;;  %v544_v32 = vld [vmem:[#allocation5 + $0xc] sm:$0xf]  ;;  %vm730_vm3 = vcmask 130048   ;;  %s1635_s17 = smov 8   ;;  %s1636_s18 = smov 16   ;;  %vm965_vm4 = vcmask 195584  }
  0x77   : > { %s1637_s23 = smov 24   ;;  %s1196_s22 = sshll.u32 %s1705_s9, 7 }
  0x78   : > { %s381_s11 = scalar_lea.vmem [#allocation11], %s1168_s2  ;;  %s1036_s9 = scalar_lea.sflag [#allocation4], %s1842_s1 }
  0x79   : > { %1228 = vmatpush3.bf16.msra.mxu0 %v1395_v2  ;;  %1236 = vmatpush3.bf16.msra.mxu1 %v1398_v5  ;;  %s1049_s13 = sshll.u32 %s381_s11, 4  ;;  %p2025_p12 = scmp.ne.s32.totalorder %s2015_s14, 0  ;;  %s1950_s13 = int_to_ptr.vmem [resolvable:$true] %s1049_s13 }
  0x7a   : > { %1241 = vmatprep.subr.bf16.mxu0 %v1630_v0  ;;  %1247 = vmatprep.subr.bf16.mxu1 %v1630_v0  ;;  %s1549_s24 = scalar_lea.vmem %s1950_s13, 128  ;;  %s1638_s2 = smov [#allocation11]  }
  0x7b   : > { %p1550_p10 = scmp.ne.s32.totalorder %s1950_s13, %s1549_s24  ;;  %s1553_s25 = sshll.u32 %s1638_s2, 4  ;;  %s1554_s25 = int_to_ptr.vmem [resolvable:$false] %s1553_s25 }
  0x7c   : > { %1230 = vmatmul.mubr.msk.bf16.vlgmr.msra.gmra.mxu0 %vm413_vm1, %v1396_v3  ;;  %1238 = vmatmul.mubr.msk.bf16.vlgmr.msra.gmra.mxu1 %vm413_vm1, %v1396_v3  ;;  %p1556_p13 = scmp.lt.s32.totalorder %s1950_s13, %s1554_s25 }
  0x7d   : > { %1243 = vmatprep.mubr.msk.bf16.mxu0 %vm1631_vm0, %v1630_v0  ;;  %1249 = vmatprep.mubr.msk.bf16.mxu1 %vm1631_vm0, %v1630_v0  ;;  %p1551_p7 = pnand %p1550_p10, %p2025_p12 }
  0x7f   : > { %p1552_p1 = pneg %p1551_p7 }
 0x13c   : > { %v451_v6 = vpop.f32.mrf.mxu0  ;;  %v515_v16 = vpop.f32.mrf.mxu1 }
 0x13d   : > { %v452_v10 = vadd.f32 %v1174_v7, %v451_v6  ;;  %v516_v27 = vadd.f32 %v1179_v22, %v515_v16 }
 0x13e   : > { %v1231_v8 = vpop.f32.mrf.mxu0  ;;  %v1239_v17 = vpop.f32.mrf.mxu1 }
 0x140   : > { %v454_v9 = vpop.f32.mrf.mxu0  ;;  %v518_v18 = vpop.f32.mrf.mxu1 }
 0x141   : > { %v455_v11 = vadd.f32 %v1174_v7, %v454_v9  ;;  %v519_v28 = vadd.f32 %v1179_v22, %v518_v18 }
 0x142   : > { %v1232_v12 = vpop.f32.mrf.mxu0  ;;  %v1240_v19 = vpop.f32.mrf.mxu1 }
 0x143   : > { %v522_v13 = vpack.c.bf16 %v455_v11, %v452_v10  ;;  %v1898_v31 = vpack.c.bf16 %v519_v28, %v516_v27 }
 0x145   : > { %529 = vrot.lane.b32.xlu1 %v522_v13, %s1632_s20  ;;  %525 = vrot.lane.b32.xlu0 %v522_v13, %s1633_s10  ;;  %v550_v14 = vsel %vm545_vm2, %v522_v13, 0 }
 0x146   : > { %1242 = vmatpush3.bf16.xpose.msra.mxu0 %v550_v14 }
 0x147   : > { %1253 = vmatprep.subr.bf16.mxu0 %v1630_v0 }
 0x149   : > { %527 = vrot.lane.b32.xlu0 %v522_v13, %s1634_s16 }
 0x14d   : > { %1244 = vmatmul.mubr.msk.bf16.vlgmr.msra.gmra.mxu0 %vm545_vm2, %v541_v15 }
 0x14e   : > { %1255 = vmatprep.mubr.msk.bf16.mxu0 %vm1631_vm0, %v1630_v0 }
 0x1b7   : > { %v526_v20 = vpop.permute.xlu0 %525  ;;  %v530_v25 = vpop.permute.xlu1 %529 }
 0x1b8   : > { %v596_v21 = vsel %vm545_vm2, %v526_v20, 0  ;;  %v688_v29 = vsel %vm545_vm2, %v530_v25, 0 }
 0x1b9   : > { %1248 = vmatpush3.bf16.xpose.msra.mxu1 %v596_v21 }
 0x1ba   : > { %1259 = vmatprep.subr.bf16.mxu1 %v1630_v0 }
 0x1bb   : > { %v528_v23 = vpop.permute.xlu0 %527 }
 0x1bc   : > { %v642_v24 = vsel %vm545_vm2, %v528_v23, 0 }
 0x1bd   : > { %1254 = vmatpush3.bf16.xpose.msra.mxu0 %v642_v24 }
 0x1be   : > { %1265 = vmatprep.subr.bf16.mxu0 %v1630_v0 }
 0x1c0   : > { %1250 = vmatmul.mubr.msk.bf16.vlgmr.msra.gmra.mxu1 %vm545_vm2, %v542_v26 }
 0x1c1   : > { %1260 = vmatpush3.bf16.xpose.msra.mxu1 %v688_v29  ;;  %1261 = vmatprep.mubr.msk.bf16.mxu1 %vm1631_vm0, %v1630_v0 }
 0x1c2   : > { %1271 = vmatprep.subr.bf16.mxu1 %v1630_v0 }
 0x1c4   : > { %1256 = vmatmul.mubr.msk.bf16.vlgmr.msra.gmra.mxu0 %vm545_vm2, %v543_v30 }
 0x1c5   : > { %1266 = vmatpush3.bf16.msra.mxu0 %v1898_v31  ;;  %1267 = vmatprep.mubr.msk.bf16.mxu0 %vm1631_vm0, %v1630_v0 }
 0x1c6   : > { %1277 = vmatprep.subr.bf16.mxu0 %v1630_v0 }
 0x1c8   : > { %1262 = vmatmul.mubr.msk.bf16.vlgmr.msra.gmra.mxu1 %vm545_vm2, %v544_v32 }
 0x1c9   : > { %1273 = vmatprep.mubr.msk.bf16.mxu1 %vm1631_vm0, %v1630_v0 }
 0x20d   : > { %v586_v33 = vpop.f32.mrf.mxu0 }
 0x20e   : > { %v731_v34 = vsel %vm730_vm3, %v586_v33, -inf }
 0x20f   : > { %732 = vmax.xlane.f32.xlu1 %v731_v34  ;;  %v1245_v35 = vpop.f32.mrf.mxu0 }
 0x211   : > { %v589_v36 = vpop.f32.mrf.mxu0 }
 0x213   : > { %v1246_v37 = vpop.f32.mrf.mxu0 }
 0x280   : > { %v632_v38 = vpop.f32.mrf.mxu1 }
 0x281   : > { %v734_v39 = vsel %vm730_vm3, %v632_v38, -inf }
 0x282   : > { %735 = vmax.xlane.f32.xlu0 %v734_v39  ;;  %v1251_v40 = vpop.f32.mrf.mxu1 }
 0x284   : > { %v635_v41 = vpop.f32.mrf.mxu1  ;;  %v678_v42 = vpop.f32.mrf.mxu0 }
 0x285   : > { %v737_v43 = vsel %vm730_vm3, %v678_v42, -inf }
 0x286   : > { %v1252_v44 = vpop.f32.mrf.mxu1  ;;  %738 = vmax.xlane.f32.xlu0 %v737_v43  ;;  %v1257_v45 = vpop.f32.mrf.mxu0 }
 0x288   : > { %v724_v46 = vpop.f32.mrf.mxu1  ;;  %v681_v47 = vpop.f32.mrf.mxu0 }
 0x289   : > { %v740_v48 = vsel %vm730_vm3, %v724_v46, -inf }
 0x28a   : > { %741 = vmax.xlane.f32.xlu1 %v740_v48  ;;  %v1263_v49 = vpop.f32.mrf.mxu1  ;;  %v1258_v50 = vpop.f32.mrf.mxu0 }
 0x28c   : > { %v727_v51 = vpop.f32.mrf.mxu1 }
 0x28e   : > { %v1264_v52 = vpop.f32.mrf.mxu1 }
 0x298   : > { %v733_v53 = vpop.xlane.xlu1 %732 }
 0x299   : > { %v743_v54 = vsub.f32 %v586_v33, %v733_v53  ;;  %v1399_v33 = vld [vmem:[#allocation10 + $0x8] sm:$0xff]   ;;  %v1191_v53 = vld [vmem:[%s1999_s7] ss:$0 sm:$0xff] }
 0x29b   : > { %v747_v55 = vmul.f32 1.442695, %v743_v54 }
 0x29d   : > { %1401 = vpow2.f32 %v747_v55 }
 0x2aa   : > { %v1402_v56 = vpop.eup %1401 }
 0x2ab   : > { %v755_v57 = vsel %vm730_vm3, %v1402_v56, 0.0 }
 0x2ac   : > { %756 = vadd.xlane.f32.xlu0 %v755_v57 }
 0x30b   : > { %v736_v58 = vpop.xlane.xlu0 %735 }
 0x30c   : > { %v744_v59 = vsub.f32 %v632_v38, %v736_v58 }
 0x30e   : > { %v749_v60 = vmul.f32 1.442695, %v744_v59 }
 0x30f   : > { %v739_v61 = vpop.xlane.xlu0 %738 }
 0x310   : > { %1403 = vpow2.f32 %v749_v60  ;;  %v745_v62 = vsub.f32 %v678_v42, %v739_v61  ;;  %v1400_v42 = vld [vmem:[#allocation10] sm:$0xff]  }
 0x312   : > { %v751_v63 = vmul.f32 1.442695, %v745_v62 }
 0x313   : > { %v742_v6 = vpop.xlane.xlu1 %741 }
 0x314   : > { %1405 = vpow2.f32 %v751_v63  ;;  %v746_v7 = vsub.f32 %v724_v46, %v742_v6 }
 0x316   : > { %v753_v8 = vmul.f32 1.442695, %v746_v7 }
 0x31d   : > { %v1404_v1 = vpop.eup %1403 }
 0x31e   : > { %v758_v2 = vsel %vm730_vm3, %v1404_v1, 0.0 }
 0x31f   : > { %759 = vadd.xlane.f32.xlu1 %v758_v2 }
 0x321   : > { %v1406_v3 = vpop.eup %1405 }
 0x322   : > { %v761_v4 = vsel %vm730_vm3, %v1406_v3, 0.0 }
 0x323   : > { %762 = vadd.xlane.f32.xlu0 %v761_v4 }
 0x330   : > { %535 = vrot.lane.b32.xlu1 %v1898_v31, %s1634_s16  ;;  %s1948_s16 = scalar_lea.hbm %s2000_s8, %s1196_s22 }
 0x335   : > { %v757_v5 = vpop.xlane.xlu0 %756 }
 0x336   : > { %1407 = vrcp.f32 %v757_v5 }
 0x337   : > { %1409 = vpow2.f32 %v753_v8 }
 0x339   : > { %532 = vrot.lane.b32.xlu0 %v1898_v31, %s1633_s10 }
 0x343   : > { %v1408_v9 = vpop.eup %1407 }
 0x344   : > { %v771_v10 = vmul.f32 %v1408_v9, %v1402_v56  ;;  %v1410_v12 = vpop.eup %1409 }
 0x345   : > { %v764_v13 = vsel %vm730_vm3, %v1410_v12, 0.0 }
 0x346   : > { %v775_v11 = vpack.c.bf16 %v771_v10, %v771_v10 }
 0x348   : > { %1268 = vmatmul.mubr.msk.bf16.vlgmr.msra.gmra.mxu0 %vm730_vm3, %v775_v11 }
 0x349   : > { %1279 = vmatprep.mubr.msk.bf16.mxu0 %vm1631_vm0, %v1630_v0 }
 0x354   : > { %765 = vadd.xlane.f32.xlu1 %v764_v13 }
 0x365   : > { %538 = vrot.lane.b32.xlu1 %v1898_v31, %s1632_s20 }
 0x3a8   : > { %v760_v14 = vpop.xlane.xlu1 %759 }
 0x3a9   : > { %1411 = vrcp.f32 %v760_v14 }
 0x3ac   : > { %v536_v15 = vpop.permute.xlu1 %535  ;;  %v763_v16 = vpop.xlane.xlu0 %762 }
 0x3ad   : > { %1413 = vrcp.f32 %v763_v16  ;;  %1278 = vmatpush3.bf16.msra.mxu0 %v536_v15 }
 0x3ae   : > { %1289 = vmatprep.subr.bf16.mxu0 %v1630_v0 }
 0x3b0   : > { %v533_v17 = vpop.permute.xlu0 %532 }
 0x3b1   : > { %1272 = vmatpush3.bf16.msra.mxu1 %v533_v17 }
 0x3b2   : > { %1283 = vmatprep.subr.bf16.mxu1 %v1630_v0 }
 0x3b6   : > { %v1412_v18 = vpop.eup %1411 }
 0x3b7   : > { %v772_v19 = vmul.f32 %v1412_v18, %v1404_v1 }
 0x3b9   : > { %v776_v20 = vpack.c.bf16 %v772_v19, %v772_v19 }
 0x3ba   : > { %v1414_v21 = vpop.eup %1413 }
 0x3bb   : > { %1274 = vmatmul.mubr.msk.bf16.vlgmr.msra.gmra.mxu1 %vm730_vm3, %v776_v20  ;;  %v773_v22 = vmul.f32 %v1414_v21, %v1406_v3 }
 0x3bc   : > { %1285 = vmatprep.mubr.msk.bf16.mxu1 %vm1631_vm0, %v1630_v0 }
 0x3bd   : > { %v777_v23 = vpack.c.bf16 %v773_v22, %v773_v22 }
 0x3bf   : > { %1280 = vmatmul.mubr.msk.bf16.vlgmr.msra.gmra.mxu0 %vm730_vm3, %v777_v23 }
 0x3c0   : > { %1293 = vmatprep.mubr.msk.bf16.mxu0 %vm1631_vm0, %v1630_v0  ;;  %1290 = vmatpush3.bf16.msra.mxu0 %v1399_v33 }
 0x3c1   : > { %1291 = vmatprep.subr.bf16.mxu0 %v1630_v0 }
 0x3c4   : > { %1292 = vmatpush3.bf16.msra.mxu0 %v1400_v42 }
 0x3dd   : > { %v766_v24 = vpop.xlane.xlu1 %765 }
 0x3de   : > { %1415 = vrcp.f32 %v766_v24 }
 0x3e1   : > { %v539_v25 = vpop.permute.xlu1 %538 }
 0x3e2   : > { %1284 = vmatpush3.bf16.msra.mxu1 %v539_v25 }
 0x3eb   : > { %v1416_v26 = vpop.eup %1415 }
 0x3ec   : > { %v774_v27 = vmul.f32 %v1416_v26, %v1410_v12 }
 0x3ee   : > { %v778_v28 = vpack.c.bf16 %v774_v27, %v774_v27 }
 0x3f0   : > { %1286 = vmatmul.mubr.msk.bf16.vlgmr.msra.gmra.mxu1 %vm730_vm3, %v778_v28 }
 0x408   : > { %v816_v29 = vpop.f32.mrf.mxu0 }
 0x40a   : > { %v1269_v30 = vpop.f32.mrf.mxu0 }
 0x40c   : > { %v819_v31 = vpop.f32.mrf.mxu0 }
 0x40e   : > { %v1270_v32 = vpop.f32.mrf.mxu0 }
 0x47b   : > { %v859_v34 = vpop.f32.mrf.mxu1 }
 0x47c   : > { %952 = vrot.lane.b32.xlu0 %v859_v34, %s1635_s17  ;;  %s1555_s17 = scalar_lea.vmem %s1554_s25, 256 }
 0x47d   : > { %v1275_v35 = vpop.f32.mrf.mxu1  ;;  %p1557_p0 = scmp.lt.s32.totalorder %s1555_s17, %s1549_s24 }
 0x47f   : > { %v862_v36 = vpop.f32.mrf.mxu1  ;;  %v902_v37 = vpop.f32.mrf.mxu0  ;;  %p1558_p11 = por %p1557_p0, %p1556_p13 }
 0x480   : > { %956 = vrot.lane.b32.xlu1 %v902_v37, %s1636_s18 }
 0x481   : > { %v1276_v38 = vpop.f32.mrf.mxu1  ;;  %v1281_v39 = vpop.f32.mrf.mxu0  ;;  %p1559_p5 = pnand %p1558_p11, %p1552_p1 }
 0x483   : > { %v905_v40 = vpop.f32.mrf.mxu0 }
 0x485   : > { %v1282_v41 = vpop.f32.mrf.mxu0 }
 0x4b0   : > { %v945_v43 = vpop.f32.mrf.mxu1 }
 0x4b1   : > { %960 = vrot.lane.b32.xlu0 %v945_v43, %s1637_s23 }
 0x4b2   : > { %v1287_v0 = vpop.f32.mrf.mxu1 }
 0x4b4   : > { %v948_v44 = vpop.f32.mrf.mxu1 }
 0x4b6   : > { %v1288_v45 = vpop.f32.mrf.mxu1 }
 0x4ee   : > { %v953_v46 = vpop.permute.xlu0 %952 }
 0x4ef   : > { %v963_v48 = vsel %vm545_vm2, %v816_v29, %v953_v46 }
 0x4f2   : > { %v957_v47 = vpop.permute.xlu1 %956 }
 0x4f3   : > { %v964_v49 = vsel %vm730_vm3, %v963_v48, %v957_v47 }
 0x523   : > { %v961_v50 = vpop.permute.xlu0 %960 }
 0x524   : > { %v966_v51 = vsel %vm965_vm4, %v964_v49, %v961_v50 }
 0x525   : > { %v967_v52 = vpack.c.bf16 %v966_v51, %v966_v51 }
 0x527   : > { %1294 = vmatmul.mubr.msk.bf16.vlgmr.msra.gmra.mxu0 %vm413_vm1, %v967_v52 }
 0x5e7   : > { %v1028_v54 = vpop.f32.mrf.mxu0 }
 0x5e8   : > { %v1029_v55 = vadd.f32 %v1191_v53, %v1028_v54 }
 0x5e9   : > { %v1295_v56 = vpop.f32.mrf.mxu0 }
 0x5ea   : > { %1034 = vst.msk [vmem:[%s381_s11] sm:$0xff] %vm413_vm1, %v1029_v55 }
 0x5eb   : > { %v1031_v57 = vpop.f32.mrf.mxu0 }
 0x5ec   : > { %1562 = shalt.err (!%p1559_p5)
}
 0x5ed   : > { %s1563_s18 = scalar_lea.hbm %s1948_s16, 128  ;;  %s1567_s21 = scalar_lea.hbm %s2000_s8, 256 }
 0x5ee   : > { %p1564_p6 = scmp.ne.s32.totalorder %s1948_s16, %s1563_s18  ;;  %p1568_p9 = scmp.lt.s32.totalorder %s1948_s16, %s2000_s8 }
 0x5ef   : > { %p1569_p2 = scmp.lt.s32.totalorder %s1567_s21, %s1563_s18 }
 0x5f0   : > { %p1565_p4 = pnand %p1564_p6, %p2025_p12 }
 0x5f1   : > { %p1570_p3 = por %p1569_p2, %p1568_p9 }
 0x5f2   : > { %p1566_p8 = pneg %p1565_p4 }
 0x5f4   : > { %p1571_p10 = pnand %p1570_p3, %p1566_p8 }
 0x5f6   : > { %1574 = shalt.err (!%p1571_p10)
}
 0x5f7   : > { %1315 = dma.vmem_to_hbm [thread:$0]  (%p2025_p12), %s1950_s13, 128, %s1948_s16, %s1036_s9   ;;  %v1296_v58 = vpop.f32.mrf.mxu0 }
 0x5f8 PF: > { %s1061_s11 = sand.u32 1, %s1609_s27   ;;  %p2026_p7 = scmp.ne.s32.totalorder %s2010_s12, 0 }
 0x5f9   : > { %p2027_p1 = scmp.ge.s32.totalorder %s1621_s30, 2  ;;  %s1062_s20 = scalar_lea.sflag [#allocation4], %s1061_s11 }
 0x5fb   : > { %p1335_p13 = pnand %p2027_p1, %p2026_p7 }
 0x5fd   : > { %p1336_p0 = pneg %p1335_p13 }
 0x5ff   : > { %1604 = dma.done.wait (%p1336_p0), %s1062_s20, 128  }
 0x600   : > { %1606 = vsyncadd (%p1336_p0), %s1062_s20, 4294967168  ;;  %p23_p11 = scmp.ge.s32.totalorder %s1784_s26, 4   ;;  %s2028_s27 = smov %s1613_s28 }
 0x601   : > { %s2029_s28 = smov %s1617_s29  ;;  %s2030_s29 = smov %s1800_s15 }
 0x602   : > { %s2031_s30 = smov %s1784_s26  ;;  %25 = sbr.rel (!%p23_p11) target bundleno = 10 (0xa), region = 113 }
 0x607   :  { %1067 = vsyncpa [#allocation3], 1 }
 0x608   :  { %1069 = vsyncpa [#allocation3 + $0x1], 1 }
 0x609   :  { %1070 = vsyncpa [#allocation6], 1 }
 0x60a   :  { %1071 = vsyncpa [#allocation9], 1 }
 0x60b   :  { %1072 = vsyncpa [#allocation4], 1 }
 0x60c   :  { %1074 = vsyncpa [#allocation4 + $0x1], 1 }

</bundles_post_ra>
